<compile_context>
chip_gen: v7x
topology: tpu7x:2x2x1
jax: 0.10.0
libtpu: 0.0.40
codegen_flags: <defaults>
</compile_context>

<pallas_src>
import functools
import math

import jax
import jax.numpy as jnp
from jax.experimental import pallas as pl
from jax.experimental.pallas import tpu as pltpu

LN_EPS = 1e-6


def _layernorm(x, gamma, beta, eps):
    mu = jnp.mean(x, axis=-1, keepdims=True)
    xc = x - mu
    var = jnp.mean(xc * xc, axis=-1, keepdims=True)
    return xc * jax.lax.rsqrt(var + eps) * gamma + beta


def _gelu_tanh(x):
    # tanh-approx GELU: one EUP op instead of the erf polynomial + divide (|delta| << 5e-3
    # versus the exact erf GELU over the activation range seen here).
    c = math.sqrt(2.0 / math.pi)
    return 0.5 * x * (1.0 + jnp.tanh(c * (x + 0.044715 * (x * x * x))))


# ----------------------------------------------------------------------------
# Fused transformer-block kernel (b_tile batch elements per grid step)
# ----------------------------------------------------------------------------
def _vit_block_kernel(x_ref,
                      ln1_g_ref, ln1_b_ref,
                      wq_ref, bq_ref, wk_ref, bk_ref, wv_ref, bv_ref,
                      wo_ref, bo_ref,
                      ln2_g_ref, ln2_b_ref,
                      w1_ref, b1_ref, w2_ref, b2_ref,
                      o_ref,
                      *, num_heads):
    BT, S, D = x_ref.shape
    M = BT * S
    x = x_ref[...].reshape(M, D)                              # (M, D) f32

    # ---- attention_norm (LayerNorm, eps=1e-6) -------------------------------
    xn = _layernorm(x, ln1_g_ref[...], ln1_b_ref[...], LN_EPS)
    xn_b = xn.astype(jnp.bfloat16)                            # bf16 MXU operand

    contract_last = (((1,), (1,)), ((), ()))                  # q . k^T without materializing k^T
    attn_out = jnp.zeros((M, D), jnp.float32)                 # f32 accumulator over heads

    for h in range(num_heads):                                # statically unrolled
        # Per-head projections: weights pre-blocked (H, D, dh); ref[h] is a leading-axis
        # (sublane-cheap) index -> no sub-128-lane extracts.  1/sqrt(dh) folded into wq/bq.
        q_h = jnp.dot(xn_b, wq_ref[h], preferred_element_type=jnp.float32) + bq_ref[h]
        k_h = jnp.dot(xn_b, wk_ref[h], preferred_element_type=jnp.float32) + bk_ref[h]
        v_h = jnp.dot(xn_b, wv_ref[h], preferred_element_type=jnp.float32) + bv_ref[h]
        q_b = q_h.astype(jnp.bfloat16)
        k_b = k_h.astype(jnp.bfloat16)
        v_b = v_h.astype(jnp.bfloat16)

        ctx_rows = []
        for b in range(BT):                                   # attention is per sequence
            r = slice(b * S, (b + 1) * S)                     # static sublane slice (cheap)
            s = jax.lax.dot_general(q_b[r], k_b[r], contract_last,
                                    preferred_element_type=jnp.float32)       # (S, S) f32
            m = jnp.max(s, axis=-1, keepdims=True)            # numerically stable softmax
            e = jnp.exp(s - m)
            denom = jnp.sum(e, axis=-1, keepdims=True)
            ctx_un = jnp.dot(e.astype(jnp.bfloat16), v_b[r],
                             preferred_element_type=jnp.float32)              # (S, dh)
            # Deferred normalization: one (S,1) approx reciprocal instead of S*S divides.
            ctx_rows.append(ctx_un * pl.reciprocal(denom, approx=True))
        ctx_h = ctx_rows[0] if BT == 1 else jnp.concatenate(ctx_rows, axis=0)

        # Per-head output projection accumulated in f32 -- no lane-axis concatenate.
        attn_out = attn_out + jnp.dot(ctx_h.astype(jnp.bfloat16), wo_ref[h],
                                      preferred_element_type=jnp.float32)

    x1 = x + attn_out + bo_ref[...]                           # residual 1 (dropout: eval no-op)

    # ---- ffn_norm + MLP (fc1 -> GELU -> fc2) + residual 2 --------------------
    x1n = _layernorm(x1, ln2_g_ref[...], ln2_b_ref[...], LN_EPS)
    hmid = jnp.dot(x1n.astype(jnp.bfloat16), w1_ref[...],
                   preferred_element_type=jnp.float32) + b1_ref[...]
    hmid = _gelu_tanh(hmid)
    y = jnp.dot(hmid.astype(jnp.bfloat16), w2_ref[...],
                preferred_element_type=jnp.float32) + b2_ref[...]

    o_ref[...] = (x1 + y).reshape(BT, S, D).astype(o_ref.dtype)


def _choose_b_tile(batch, seq):
    """Batch elements per grid step: fill the MXU M-dim (~512 rows) while keeping at least
    two independent grid steps so both v7x TensorCores stay busy."""
    target = max(1, 512 // max(seq, 1))
    best = 1
    for cand in range(1, batch + 1):
        if batch % cand != 0 or cand > target:
            continue
        if batch // cand >= 2 or batch == 1:
            best = cand
    return best


def vit_block_pallas(x, params, *, num_heads, b_tile=None):
    N, S, D = x.shape
    assert D % num_heads == 0, "hidden_size must be divisible by num_heads"
    H = num_heads
    dh = D // H
    if b_tile is None:
        b_tile = _choose_b_tile(N, S)
    assert N % b_tile == 0

    p = params
    scale = 1.0 / math.sqrt(dh)
    bf16 = jnp.bfloat16

    def heads_in(w):      # (D, H*dh) -> (H, D, dh): head h gets columns [h*dh:(h+1)*dh]
        return jnp.transpose(w.reshape(D, H, dh), (1, 0, 2))

    def heads_bias(b):    # (1, H*dh) -> (H, 1, dh)
        return jnp.transpose(b.reshape(1, H, dh), (1, 0, 2))

    weight_args = [
        p["ln1_g"].astype(jnp.float32), p["ln1_b"].astype(jnp.float32),
        heads_in(p["wq"] * scale).astype(bf16), heads_bias(p["bq"] * scale).astype(jnp.float32),
        heads_in(p["wk"]).astype(bf16),         heads_bias(p["bk"]).astype(jnp.float32),
        heads_in(p["wv"]).astype(bf16),         heads_bias(p["bv"]).astype(jnp.float32),
        p["wo"].reshape(H, dh, D).astype(bf16), p["bo"].astype(jnp.float32),
        p["ln2_g"].astype(jnp.float32), p["ln2_b"].astype(jnp.float32),
        p["w1"].astype(bf16), p["b1"].astype(jnp.float32),
        p["w2"].astype(bf16), p["b2"].astype(jnp.float32),
    ]

    def const_spec(arr):
        # grid-invariant (weights / biases / LN params): same full-extent block every step,
        # so its DMA is only issued once by the pipeline.
        return pl.BlockSpec(arr.shape, lambda n, _nd=arr.ndim: (0,) * _nd)

    in_specs = [pl.BlockSpec((b_tile, S, D), lambda n: (n, 0, 0))] + \
               [const_spec(a) for a in weight_args]

    return pl.pallas_call(
        functools.partial(_vit_block_kernel, num_heads=num_heads),
        out_shape=jax.ShapeDtypeStruct((N, S, D), jnp.float32),
        grid_spec=pltpu.PrefetchScalarGridSpec(
            num_scalar_prefetch=0,
            grid=(N // b_tile,),
            in_specs=in_specs,
            out_specs=pl.BlockSpec((b_tile, S, D), lambda n: (n, 0, 0)),
        ),
        compiler_params=pltpu.CompilerParams(
            dimension_semantics=("parallel",),
            vmem_limit_bytes=48 * 1024 * 1024,
        ),
    )(x, *weight_args)


# ----------------------------------------------------------------------------
# Parameters + public forward (matches Block.forward eval-mode semantics)
# ----------------------------------------------------------------------------
def make_block_params(key, hidden, mlp_dim):
    ks = jax.random.split(key, 16)

    def lin(kw, kb, din, dout, w_std=0.02, b_std=1e-6):
        w = w_std * jax.random.normal(kw, (din, dout), jnp.float32)
        b = b_std * jax.random.normal(kb, (1, dout), jnp.float32)
        return w, b

    wq, bq = lin(ks[0], ks[1], hidden, hidden)
    wk, bk = lin(ks[2], ks[3], hidden, hidden)
    wv, bv = lin(ks[4], ks[5], hidden, hidden)
    wo, bo = lin(ks[6], ks[7], hidden, hidden)
    w1, b1 = lin(ks[8], ks[9], hidden, mlp_dim)
    w2, b2 = lin(ks[10], ks[11], mlp_dim, hidden)
    ln1_g = 1.0 + 0.02 * jax.random.normal(ks[12], (1, hidden), jnp.float32)
    ln1_b = 0.02 * jax.random.normal(ks[13], (1, hidden), jnp.float32)
    ln2_g = 1.0 + 0.02 * jax.random.normal(ks[14], (1, hidden), jnp.float32)
    ln2_b = 0.02 * jax.random.normal(ks[15], (1, hidden), jnp.float32)
    return {"ln1_g": ln1_g, "ln1_b": ln1_b,
            "wq": wq, "bq": bq, "wk": wk, "bk": bk, "wv": wv, "bv": bv,
            "wo": wo, "bo": bo,
            "ln2_g": ln2_g, "ln2_b": ln2_b,
            "w1": w1, "b1": b1, "w2": w2, "b2": b2}


@functools.partial(jax.jit, static_argnames=("num_heads",))
def block_forward(params, x, *, num_heads):
    out = vit_block_pallas(x.astype(jnp.float32), params, num_heads=num_heads)
    # TODO(synk): vis=True path (returning the attention-probability tensor) is not
    # materialized from the fused kernel; forward matches vis=False -> weights is None.
    return out, None


# Pure-JAX f32 reference (exact math, un-fused) used only for the sanity check below.
def block_forward_reference(params, x, *, num_heads):
    p = params
    N, S, D = x.shape
    dh = D // num_heads

    def ln(v, g, b):
        mu = jnp.mean(v, -1, keepdims=True)
        var = jnp.mean((v - mu) ** 2, -1, keepdims=True)
        return (v - mu) / jnp.sqrt(var + LN_EPS) * g + b

    xn = ln(x, p["ln1_g"], p["ln1_b"])
    q = xn @ p["wq"] + p["bq"]
    k = xn @ p["wk"] + p["bk"]
    v = xn @ p["wv"] + p["bv"]
    qh = q.reshape(N, S, num_heads, dh).transpose(0, 2, 1, 3)
    kh = k.reshape(N, S, num_heads, dh).transpose(0, 2, 1, 3)
    vh = v.reshape(N, S, num_heads, dh).transpose(0, 2, 1, 3)
    s = jnp.einsum("nhqd,nhkd->nhqk", qh, kh) / math.sqrt(dh)
    a = jax.nn.softmax(s, axis=-1)
    ctx = jnp.einsum("nhqk,nhkd->nhqd", a, vh).transpose(0, 2, 1, 3).reshape(N, S, D)
    x1 = x + ctx @ p["wo"] + p["bo"]
    x1n = ln(x1, p["ln2_g"], p["ln2_b"])
    h = jax.nn.gelu(x1n @ p["w1"] + p["b1"], approximate=False)
    return x1 + h @ p["w2"] + p["b2"]


if __name__ == "__main__":
    key = jax.random.PRNGKey(0)
    kp, kx = jax.random.split(key)

    batch, seq, hidden, mlp_dim, num_heads = 2, 8, 32, 128, 4

    params = make_block_params(kp, hidden, mlp_dim)
    x = jax.random.normal(kx, (batch, seq, hidden), jnp.float32)

    out, attn_w = block_forward(params, x, num_heads=num_heads)
    jax.block_until_ready(out)
    assert out.shape == (batch, seq, hidden), out.shape

    ref = block_forward_reference(params, x, num_heads=num_heads)
    err = float(jnp.max(jnp.abs(out - ref)))
    # bf16 MXU operands + approx reciprocal + tanh-GELU vs the exact f32 reference.
    assert err < 1e-2, f"mismatch vs reference: {err}"

    print("KERNEL_OK")
</pallas_src>

<mosaic_0001>
module attributes {stable_mosaic.version = 11 : i64} {
  func.func @_vit_block_kernel(%arg0: i32, %arg1: memref<1x8x32xf32, #tpu.memory_space<vmem>>, %arg2: memref<1x32xf32, #tpu.memory_space<vmem>>, %arg3: memref<1x32xf32, #tpu.memory_space<vmem>>, %arg4: memref<4x32x8xbf16, #tpu.memory_space<vmem>>, %arg5: memref<4x1x8xf32, #tpu.memory_space<vmem>>, %arg6: memref<4x32x8xbf16, #tpu.memory_space<vmem>>, %arg7: memref<4x1x8xf32, #tpu.memory_space<vmem>>, %arg8: memref<4x32x8xbf16, #tpu.memory_space<vmem>>, %arg9: memref<4x1x8xf32, #tpu.memory_space<vmem>>, %arg10: memref<4x8x32xbf16, #tpu.memory_space<vmem>>, %arg11: memref<1x32xf32, #tpu.memory_space<vmem>>, %arg12: memref<1x32xf32, #tpu.memory_space<vmem>>, %arg13: memref<1x32xf32, #tpu.memory_space<vmem>>, %arg14: memref<32x128xbf16, #tpu.memory_space<vmem>>, %arg15: memref<1x128xf32, #tpu.memory_space<vmem>>, %arg16: memref<128x32xbf16, #tpu.memory_space<vmem>>, %arg17: memref<1x32xf32, #tpu.memory_space<vmem>>, %arg18: memref<1x8x32xf32, #tpu.memory_space<vmem>>) attributes {dimension_semantics = [#tpu.dimension_semantics<parallel>], iteration_bounds = array<i64: 2>, scalar_prefetch = 0 : i64, scratch_operands = 0 : i64, tpu.core_type = #tpu.core_type<tc>, window_params = [{transform_indices = @transform_0, window_bounds = array<i64: 1, 8, 32>}, {pipeline_mode = #tpu.pipeline_mode<synchronous>, transform_indices = @transform_1, window_bounds = array<i64: 1, 32>}, {pipeline_mode = #tpu.pipeline_mode<synchronous>, transform_indices = @transform_2, window_bounds = array<i64: 1, 32>}, {pipeline_mode = #tpu.pipeline_mode<synchronous>, transform_indices = @transform_3, window_bounds = array<i64: 4, 32, 8>}, {pipeline_mode = #tpu.pipeline_mode<synchronous>, transform_indices = @transform_4, window_bounds = array<i64: 4, 1, 8>}, {pipeline_mode = #tpu.pipeline_mode<synchronous>, transform_indices = @transform_5, window_bounds = array<i64: 4, 32, 8>}, {pipeline_mode = #tpu.pipeline_mode<synchronous>, transform_indices = @transform_6, window_bounds = array<i64: 4, 1, 8>}, {pipeline_mode = #tpu.pipeline_mode<synchronous>, transform_indices = @transform_7, window_bounds = array<i64: 4, 32, 8>}, {pipeline_mode = #tpu.pipeline_mode<synchronous>, transform_indices = @transform_8, window_bounds = array<i64: 4, 1, 8>}, {pipeline_mode = #tpu.pipeline_mode<synchronous>, transform_indices = @transform_9, window_bounds = array<i64: 4, 8, 32>}, {pipeline_mode = #tpu.pipeline_mode<synchronous>, transform_indices = @transform_10, window_bounds = array<i64: 1, 32>}, {pipeline_mode = #tpu.pipeline_mode<synchronous>, transform_indices = @transform_11, window_bounds = array<i64: 1, 32>}, {pipeline_mode = #tpu.pipeline_mode<synchronous>, transform_indices = @transform_12, window_bounds = array<i64: 1, 32>}, {pipeline_mode = #tpu.pipeline_mode<synchronous>, transform_indices = @transform_13, window_bounds = array<i64: 32, 128>}, {pipeline_mode = #tpu.pipeline_mode<synchronous>, transform_indices = @transform_14, window_bounds = array<i64: 1, 128>}, {pipeline_mode = #tpu.pipeline_mode<synchronous>, transform_indices = @transform_15, window_bounds = array<i64: 128, 32>}, {pipeline_mode = #tpu.pipeline_mode<synchronous>, transform_indices = @transform_16, window_bounds = array<i64: 1, 32>}, {transform_indices = @transform_17, window_bounds = array<i64: 1, 8, 32>}]} {
    %c0 = arith.constant 0 : index
    %c0_0 = arith.constant 0 : index
    %c0_1 = arith.constant 0 : index
    %0 = vector.load %arg1[%c0, %c0_0, %c0_1] : memref<1x8x32xf32, #tpu.memory_space<vmem>>, vector<1x8x32xf32>
    %1 = vector.shape_cast %0 : vector<1x8x32xf32> to vector<8x32xf32>
    %c0_2 = arith.constant 0 : index
    %c0_3 = arith.constant 0 : index
    %2 = vector.load %arg2[%c0_2, %c0_3] : memref<1x32xf32, #tpu.memory_space<vmem>>, vector<1x32xf32>
    %c0_4 = arith.constant 0 : index
    %c0_5 = arith.constant 0 : index
    %3 = vector.load %arg3[%c0_4, %c0_5] : memref<1x32xf32, #tpu.memory_space<vmem>>, vector<1x32xf32>
    %cst = arith.constant dense<0.000000e+00> : vector<8xf32>
    %4 = vector.multi_reduction <add>, %1, %cst [1] : vector<8x32xf32> to vector<8xf32>
    %5 = vector.shape_cast %4 : vector<8xf32> to vector<8x1xf32>
    %cst_6 = arith.constant 3.200000e+01 : f32
    %6 = vector.broadcast %cst_6 : f32 to vector<8x1xf32>
    %7 = arith.divf %5, %6 : vector<8x1xf32>
    %8 = vector.broadcast %7 : vector<8x1xf32> to vector<8x32xf32>
    %9 = arith.subf %1, %8 : vector<8x32xf32>
    %10 = arith.mulf %9, %9 : vector<8x32xf32>
    %cst_7 = arith.constant dense<0.000000e+00> : vector<8xf32>
    %11 = vector.multi_reduction <add>, %10, %cst_7 [1] : vector<8x32xf32> to vector<8xf32>
    %12 = vector.shape_cast %11 : vector<8xf32> to vector<8x1xf32>
    %cst_8 = arith.constant 3.200000e+01 : f32
    %13 = vector.broadcast %cst_8 : f32 to vector<8x1xf32>
    %14 = arith.divf %12, %13 : vector<8x1xf32>
    %cst_9 = arith.constant 9.99999997E-7 : f32
    %15 = vector.broadcast %cst_9 : f32 to vector<8x1xf32>
    %16 = arith.addf %14, %15 : vector<8x1xf32>
    %17 = math.rsqrt %16 : vector<8x1xf32>
    %18 = vector.broadcast %17 : vector<8x1xf32> to vector<8x32xf32>
    %19 = arith.mulf %9, %18 : vector<8x32xf32>
    %20 = vector.broadcast %2 : vector<1x32xf32> to vector<8x32xf32>
    %21 = arith.mulf %19, %20 : vector<8x32xf32>
    %22 = vector.broadcast %3 : vector<1x32xf32> to vector<8x32xf32>
    %23 = arith.addf %21, %22 : vector<8x32xf32>
    %24 = arith.truncf %23 : vector<8x32xf32> to vector<8x32xbf16>
    %cst_10 = arith.constant 0.000000e+00 : f32
    %25 = vector.broadcast %cst_10 : f32 to vector<8x32xf32>
    %c0_11 = arith.constant 0 : index
    %c0_12 = arith.constant 0 : index
    %c0_13 = arith.constant 0 : index
    %26 = vector.load %arg4[%c0_11, %c0_12, %c0_13] : memref<4x32x8xbf16, #tpu.memory_space<vmem>>, vector<1x32x8xbf16>
    %27 = vector.shape_cast %26 : vector<1x32x8xbf16> to vector<32x8xbf16>
    %cst_14 = arith.constant dense<0.000000e+00> : vector<8x8xf32>
    %28 = tpu.matmul %24, %27, %cst_14 {dimension_numbers = #tpu.dot_dimension_numbers<[1], [0], [0], [1], [0, 0, 1, 1], [], []>} : vector<8x32xbf16>, vector<32x8xbf16>, vector<8x8xf32> -> vector<8x8xf32>
    %c0_15 = arith.constant 0 : index
    %c0_16 = arith.constant 0 : index
    %c0_17 = arith.constant 0 : index
    %29 = vector.load %arg5[%c0_15, %c0_16, %c0_17] : memref<4x1x8xf32, #tpu.memory_space<vmem>>, vector<1x1x8xf32>
    %30 = vector.shape_cast %29 : vector<1x1x8xf32> to vector<1x8xf32>
    %31 = vector.broadcast %30 : vector<1x8xf32> to vector<8x8xf32>
    %32 = arith.addf %28, %31 : vector<8x8xf32>
    %c0_18 = arith.constant 0 : index
    %c0_19 = arith.constant 0 : index
    %c0_20 = arith.constant 0 : index
    %33 = vector.load %arg6[%c0_18, %c0_19, %c0_20] : memref<4x32x8xbf16, #tpu.memory_space<vmem>>, vector<1x32x8xbf16>
    %34 = vector.shape_cast %33 : vector<1x32x8xbf16> to vector<32x8xbf16>
    %cst_21 = arith.constant dense<0.000000e+00> : vector<8x8xf32>
    %35 = tpu.matmul %24, %34, %cst_21 {dimension_numbers = #tpu.dot_dimension_numbers<[1], [0], [0], [1], [0, 0, 1, 1], [], []>} : vector<8x32xbf16>, vector<32x8xbf16>, vector<8x8xf32> -> vector<8x8xf32>
    %c0_22 = arith.constant 0 : index
    %c0_23 = arith.constant 0 : index
    %c0_24 = arith.constant 0 : index
    %36 = vector.load %arg7[%c0_22, %c0_23, %c0_24] : memref<4x1x8xf32, #tpu.memory_space<vmem>>, vector<1x1x8xf32>
    %37 = vector.shape_cast %36 : vector<1x1x8xf32> to vector<1x8xf32>
    %38 = vector.broadcast %37 : vector<1x8xf32> to vector<8x8xf32>
    %39 = arith.addf %35, %38 : vector<8x8xf32>
    %c0_25 = arith.constant 0 : index
    %c0_26 = arith.constant 0 : index
    %c0_27 = arith.constant 0 : index
    %40 = vector.load %arg8[%c0_25, %c0_26, %c0_27] : memref<4x32x8xbf16, #tpu.memory_space<vmem>>, vector<1x32x8xbf16>
    %41 = vector.shape_cast %40 : vector<1x32x8xbf16> to vector<32x8xbf16>
    %cst_28 = arith.constant dense<0.000000e+00> : vector<8x8xf32>
    %42 = tpu.matmul %24, %41, %cst_28 {dimension_numbers = #tpu.dot_dimension_numbers<[1], [0], [0], [1], [0, 0, 1, 1], [], []>} : vector<8x32xbf16>, vector<32x8xbf16>, vector<8x8xf32> -> vector<8x8xf32>
    %c0_29 = arith.constant 0 : index
    %c0_30 = arith.constant 0 : index
    %c0_31 = arith.constant 0 : index
    %43 = vector.load %arg9[%c0_29, %c0_30, %c0_31] : memref<4x1x8xf32, #tpu.memory_space<vmem>>, vector<1x1x8xf32>
    %44 = vector.shape_cast %43 : vector<1x1x8xf32> to vector<1x8xf32>
    %45 = vector.broadcast %44 : vector<1x8xf32> to vector<8x8xf32>
    %46 = arith.addf %42, %45 : vector<8x8xf32>
    %47 = arith.truncf %32 : vector<8x8xf32> to vector<8x8xbf16>
    %48 = arith.truncf %39 : vector<8x8xf32> to vector<8x8xbf16>
    %49 = arith.truncf %46 : vector<8x8xf32> to vector<8x8xbf16>
    %cst_32 = arith.constant dense<0.000000e+00> : vector<8x8xf32>
    %50 = tpu.matmul %47, %48, %cst_32 {dimension_numbers = #tpu.dot_dimension_numbers<[1], [1], [0], [0], [0, 0, 1, 0], [], []>} : vector<8x8xbf16>, vector<8x8xbf16>, vector<8x8xf32> -> vector<8x8xf32>
    %cst_33 = arith.constant dense<0xFF800000> : vector<8xf32>
    %51 = vector.multi_reduction <maximumf>, %50, %cst_33 [1] : vector<8x8xf32> to vector<8xf32>
    %52 = vector.shape_cast %51 : vector<8xf32> to vector<8x1xf32>
    %53 = vector.broadcast %52 : vector<8x1xf32> to vector<8x8xf32>
    %54 = arith.subf %50, %53 : vector<8x8xf32>
    %55 = math.exp %54 : vector<8x8xf32>
    %cst_34 = arith.constant dense<0.000000e+00> : vector<8xf32>
    %56 = vector.multi_reduction <add>, %55, %cst_34 [1] : vector<8x8xf32> to vector<8xf32>
    %57 = vector.shape_cast %56 : vector<8xf32> to vector<8x1xf32>
    %58 = arith.truncf %55 : vector<8x8xf32> to vector<8x8xbf16>
    %cst_35 = arith.constant dense<0.000000e+00> : vector<8x8xf32>
    %59 = tpu.matmul %58, %49, %cst_35 {dimension_numbers = #tpu.dot_dimension_numbers<[1], [0], [0], [1], [0, 0, 1, 1], [], []>} : vector<8x8xbf16>, vector<8x8xbf16>, vector<8x8xf32> -> vector<8x8xf32>
    %60 = tpu.reciprocal %57 {approx = true} : vector<8x1xf32> -> vector<8x1xf32>
    %61 = vector.broadcast %60 : vector<8x1xf32> to vector<8x8xf32>
    %62 = arith.mulf %59, %61 : vector<8x8xf32>
    %63 = arith.truncf %62 : vector<8x8xf32> to vector<8x8xbf16>
    %c0_36 = arith.constant 0 : index
    %c0_37 = arith.constant 0 : index
    %c0_38 = arith.constant 0 : index
    %64 = vector.load %arg10[%c0_36, %c0_37, %c0_38] : memref<4x8x32xbf16, #tpu.memory_space<vmem>>, vector<1x8x32xbf16>
    %65 = vector.shape_cast %64 : vector<1x8x32xbf16> to vector<8x32xbf16>
    %cst_39 = arith.constant dense<0.000000e+00> : vector<8x32xf32>
    %66 = tpu.matmul %63, %65, %cst_39 {dimension_numbers = #tpu.dot_dimension_numbers<[1], [0], [0], [1], [0, 0, 1, 1], [], []>} : vector<8x8xbf16>, vector<8x32xbf16>, vector<8x32xf32> -> vector<8x32xf32>
    %67 = arith.addf %25, %66 : vector<8x32xf32>
    %c1 = arith.constant 1 : index
    %c0_40 = arith.constant 0 : index
    %c0_41 = arith.constant 0 : index
    %68 = vector.load %arg4[%c1, %c0_40, %c0_41] : memref<4x32x8xbf16, #tpu.memory_space<vmem>>, vector<1x32x8xbf16>
    %69 = vector.shape_cast %68 : vector<1x32x8xbf16> to vector<32x8xbf16>
    %cst_42 = arith.constant dense<0.000000e+00> : vector<8x8xf32>
    %70 = tpu.matmul %24, %69, %cst_42 {dimension_numbers = #tpu.dot_dimension_numbers<[1], [0], [0], [1], [0, 0, 1, 1], [], []>} : vector<8x32xbf16>, vector<32x8xbf16>, vector<8x8xf32> -> vector<8x8xf32>
    %c1_43 = arith.constant 1 : index
    %c0_44 = arith.constant 0 : index
    %c0_45 = arith.constant 0 : index
    %71 = vector.load %arg5[%c1_43, %c0_44, %c0_45] : memref<4x1x8xf32, #tpu.memory_space<vmem>>, vector<1x1x8xf32>
    %72 = vector.shape_cast %71 : vector<1x1x8xf32> to vector<1x8xf32>
    %73 = vector.broadcast %72 : vector<1x8xf32> to vector<8x8xf32>
    %74 = arith.addf %70, %73 : vector<8x8xf32>
    %c1_46 = arith.constant 1 : index
    %c0_47 = arith.constant 0 : index
    %c0_48 = arith.constant 0 : index
    %75 = vector.load %arg6[%c1_46, %c0_47, %c0_48] : memref<4x32x8xbf16, #tpu.memory_space<vmem>>, vector<1x32x8xbf16>
    %76 = vector.shape_cast %75 : vector<1x32x8xbf16> to vector<32x8xbf16>
    %cst_49 = arith.constant dense<0.000000e+00> : vector<8x8xf32>
    %77 = tpu.matmul %24, %76, %cst_49 {dimension_numbers = #tpu.dot_dimension_numbers<[1], [0], [0], [1], [0, 0, 1, 1], [], []>} : vector<8x32xbf16>, vector<32x8xbf16>, vector<8x8xf32> -> vector<8x8xf32>
    %c1_50 = arith.constant 1 : index
    %c0_51 = arith.constant 0 : index
    %c0_52 = arith.constant 0 : index
    %78 = vector.load %arg7[%c1_50, %c0_51, %c0_52] : memref<4x1x8xf32, #tpu.memory_space<vmem>>, vector<1x1x8xf32>
    %79 = vector.shape_cast %78 : vector<1x1x8xf32> to vector<1x8xf32>
    %80 = vector.broadcast %79 : vector<1x8xf32> to vector<8x8xf32>
    %81 = arith.addf %77, %80 : vector<8x8xf32>
    %c1_53 = arith.constant 1 : index
    %c0_54 = arith.constant 0 : index
    %c0_55 = arith.constant 0 : index
    %82 = vector.load %arg8[%c1_53, %c0_54, %c0_55] : memref<4x32x8xbf16, #tpu.memory_space<vmem>>, vector<1x32x8xbf16>
    %83 = vector.shape_cast %82 : vector<1x32x8xbf16> to vector<32x8xbf16>
    %cst_56 = arith.constant dense<0.000000e+00> : vector<8x8xf32>
    %84 = tpu.matmul %24, %83, %cst_56 {dimension_numbers = #tpu.dot_dimension_numbers<[1], [0], [0], [1], [0, 0, 1, 1], [], []>} : vector<8x32xbf16>, vector<32x8xbf16>, vector<8x8xf32> -> vector<8x8xf32>
    %c1_57 = arith.constant 1 : index
    %c0_58 = arith.constant 0 : index
    %c0_59 = arith.constant 0 : index
    %85 = vector.load %arg9[%c1_57, %c0_58, %c0_59] : memref<4x1x8xf32, #tpu.memory_space<vmem>>, vector<1x1x8xf32>
    %86 = vector.shape_cast %85 : vector<1x1x8xf32> to vector<1x8xf32>
    %87 = vector.broadcast %86 : vector<1x8xf32> to vector<8x8xf32>
    %88 = arith.addf %84, %87 : vector<8x8xf32>
    %89 = arith.truncf %74 : vector<8x8xf32> to vector<8x8xbf16>
    %90 = arith.truncf %81 : vector<8x8xf32> to vector<8x8xbf16>
    %91 = arith.truncf %88 : vector<8x8xf32> to vector<8x8xbf16>
    %cst_60 = arith.constant dense<0.000000e+00> : vector<8x8xf32>
    %92 = tpu.matmul %89, %90, %cst_60 {dimension_numbers = #tpu.dot_dimension_numbers<[1], [1], [0], [0], [0, 0, 1, 0], [], []>} : vector<8x8xbf16>, vector<8x8xbf16>, vector<8x8xf32> -> vector<8x8xf32>
    %cst_61 = arith.constant dense<0xFF800000> : vector<8xf32>
    %93 = vector.multi_reduction <maximumf>, %92, %cst_61 [1] : vector<8x8xf32> to vector<8xf32>
    %94 = vector.shape_cast %93 : vector<8xf32> to vector<8x1xf32>
    %95 = vector.broadcast %94 : vector<8x1xf32> to vector<8x8xf32>
    %96 = arith.subf %92, %95 : vector<8x8xf32>
    %97 = math.exp %96 : vector<8x8xf32>
    %cst_62 = arith.constant dense<0.000000e+00> : vector<8xf32>
    %98 = vector.multi_reduction <add>, %97, %cst_62 [1] : vector<8x8xf32> to vector<8xf32>
    %99 = vector.shape_cast %98 : vector<8xf32> to vector<8x1xf32>
    %100 = arith.truncf %97 : vector<8x8xf32> to vector<8x8xbf16>
    %cst_63 = arith.constant dense<0.000000e+00> : vector<8x8xf32>
    %101 = tpu.matmul %100, %91, %cst_63 {dimension_numbers = #tpu.dot_dimension_numbers<[1], [0], [0], [1], [0, 0, 1, 1], [], []>} : vector<8x8xbf16>, vector<8x8xbf16>, vector<8x8xf32> -> vector<8x8xf32>
    %102 = tpu.reciprocal %99 {approx = true} : vector<8x1xf32> -> vector<8x1xf32>
    %103 = vector.broadcast %102 : vector<8x1xf32> to vector<8x8xf32>
    %104 = arith.mulf %101, %103 : vector<8x8xf32>
    %105 = arith.truncf %104 : vector<8x8xf32> to vector<8x8xbf16>
    %c1_64 = arith.constant 1 : index
    %c0_65 = arith.constant 0 : index
    %c0_66 = arith.constant 0 : index
    %106 = vector.load %arg10[%c1_64, %c0_65, %c0_66] : memref<4x8x32xbf16, #tpu.memory_space<vmem>>, vector<1x8x32xbf16>
    %107 = vector.shape_cast %106 : vector<1x8x32xbf16> to vector<8x32xbf16>
    %cst_67 = arith.constant dense<0.000000e+00> : vector<8x32xf32>
    %108 = tpu.matmul %105, %107, %cst_67 {dimension_numbers = #tpu.dot_dimension_numbers<[1], [0], [0], [1], [0, 0, 1, 1], [], []>} : vector<8x8xbf16>, vector<8x32xbf16>, vector<8x32xf32> -> vector<8x32xf32>
    %109 = arith.addf %67, %108 : vector<8x32xf32>
    %c2 = arith.constant 2 : index
    %c0_68 = arith.constant 0 : index
    %c0_69 = arith.constant 0 : index
    %110 = vector.load %arg4[%c2, %c0_68, %c0_69] : memref<4x32x8xbf16, #tpu.memory_space<vmem>>, vector<1x32x8xbf16>
    %111 = vector.shape_cast %110 : vector<1x32x8xbf16> to vector<32x8xbf16>
    %cst_70 = arith.constant dense<0.000000e+00> : vector<8x8xf32>
    %112 = tpu.matmul %24, %111, %cst_70 {dimension_numbers = #tpu.dot_dimension_numbers<[1], [0], [0], [1], [0, 0, 1, 1], [], []>} : vector<8x32xbf16>, vector<32x8xbf16>, vector<8x8xf32> -> vector<8x8xf32>
    %c2_71 = arith.constant 2 : index
    %c0_72 = arith.constant 0 : index
    %c0_73 = arith.constant 0 : index
    %113 = vector.load %arg5[%c2_71, %c0_72, %c0_73] : memref<4x1x8xf32, #tpu.memory_space<vmem>>, vector<1x1x8xf32>
    %114 = vector.shape_cast %113 : vector<1x1x8xf32> to vector<1x8xf32>
    %115 = vector.broadcast %114 : vector<1x8xf32> to vector<8x8xf32>
    %116 = arith.addf %112, %115 : vector<8x8xf32>
    %c2_74 = arith.constant 2 : index
    %c0_75 = arith.constant 0 : index
    %c0_76 = arith.constant 0 : index
    %117 = vector.load %arg6[%c2_74, %c0_75, %c0_76] : memref<4x32x8xbf16, #tpu.memory_space<vmem>>, vector<1x32x8xbf16>
    %118 = vector.shape_cast %117 : vector<1x32x8xbf16> to vector<32x8xbf16>
    %cst_77 = arith.constant dense<0.000000e+00> : vector<8x8xf32>
    %119 = tpu.matmul %24, %118, %cst_77 {dimension_numbers = #tpu.dot_dimension_numbers<[1], [0], [0], [1], [0, 0, 1, 1], [], []>} : vector<8x32xbf16>, vector<32x8xbf16>, vector<8x8xf32> -> vector<8x8xf32>
    %c2_78 = arith.constant 2 : index
    %c0_79 = arith.constant 0 : index
    %c0_80 = arith.constant 0 : index
    %120 = vector.load %arg7[%c2_78, %c0_79, %c0_80] : memref<4x1x8xf32, #tpu.memory_space<vmem>>, vector<1x1x8xf32>
    %121 = vector.shape_cast %120 : vector<1x1x8xf32> to vector<1x8xf32>
    %122 = vector.broadcast %121 : vector<1x8xf32> to vector<8x8xf32>
    %123 = arith.addf %119, %122 : vector<8x8xf32>
    %c2_81 = arith.constant 2 : index
    %c0_82 = arith.constant 0 : index
    %c0_83 = arith.constant 0 : index
    %124 = vector.load %arg8[%c2_81, %c0_82, %c0_83] : memref<4x32x8xbf16, #tpu.memory_space<vmem>>, vector<1x32x8xbf16>
    %125 = vector.shape_cast %124 : vector<1x32x8xbf16> to vector<32x8xbf16>
    %cst_84 = arith.constant dense<0.000000e+00> : vector<8x8xf32>
    %126 = tpu.matmul %24, %125, %cst_84 {dimension_numbers = #tpu.dot_dimension_numbers<[1], [0], [0], [1], [0, 0, 1, 1], [], []>} : vector<8x32xbf16>, vector<32x8xbf16>, vector<8x8xf32> -> vector<8x8xf32>
    %c2_85 = arith.constant 2 : index
    %c0_86 = arith.constant 0 : index
    %c0_87 = arith.constant 0 : index
    %127 = vector.load %arg9[%c2_85, %c0_86, %c0_87] : memref<4x1x8xf32, #tpu.memory_space<vmem>>, vector<1x1x8xf32>
    %128 = vector.shape_cast %127 : vector<1x1x8xf32> to vector<1x8xf32>
    %129 = vector.broadcast %128 : vector<1x8xf32> to vector<8x8xf32>
    %130 = arith.addf %126, %129 : vector<8x8xf32>
    %131 = arith.truncf %116 : vector<8x8xf32> to vector<8x8xbf16>
    %132 = arith.truncf %123 : vector<8x8xf32> to vector<8x8xbf16>
    %133 = arith.truncf %130 : vector<8x8xf32> to vector<8x8xbf16>
    %cst_88 = arith.constant dense<0.000000e+00> : vector<8x8xf32>
    %134 = tpu.matmul %131, %132, %cst_88 {dimension_numbers = #tpu.dot_dimension_numbers<[1], [1], [0], [0], [0, 0, 1, 0], [], []>} : vector<8x8xbf16>, vector<8x8xbf16>, vector<8x8xf32> -> vector<8x8xf32>
    %cst_89 = arith.constant dense<0xFF800000> : vector<8xf32>
    %135 = vector.multi_reduction <maximumf>, %134, %cst_89 [1] : vector<8x8xf32> to vector<8xf32>
    %136 = vector.shape_cast %135 : vector<8xf32> to vector<8x1xf32>
    %137 = vector.broadcast %136 : vector<8x1xf32> to vector<8x8xf32>
    %138 = arith.subf %134, %137 : vector<8x8xf32>
    %139 = math.exp %138 : vector<8x8xf32>
    %cst_90 = arith.constant dense<0.000000e+00> : vector<8xf32>
    %140 = vector.multi_reduction <add>, %139, %cst_90 [1] : vector<8x8xf32> to vector<8xf32>
    %141 = vector.shape_cast %140 : vector<8xf32> to vector<8x1xf32>
    %142 = arith.truncf %139 : vector<8x8xf32> to vector<8x8xbf16>
    %cst_91 = arith.constant dense<0.000000e+00> : vector<8x8xf32>
    %143 = tpu.matmul %142, %133, %cst_91 {dimension_numbers = #tpu.dot_dimension_numbers<[1], [0], [0], [1], [0, 0, 1, 1], [], []>} : vector<8x8xbf16>, vector<8x8xbf16>, vector<8x8xf32> -> vector<8x8xf32>
    %144 = tpu.reciprocal %141 {approx = true} : vector<8x1xf32> -> vector<8x1xf32>
    %145 = vector.broadcast %144 : vector<8x1xf32> to vector<8x8xf32>
    %146 = arith.mulf %143, %145 : vector<8x8xf32>
    %147 = arith.truncf %146 : vector<8x8xf32> to vector<8x8xbf16>
    %c2_92 = arith.constant 2 : index
    %c0_93 = arith.constant 0 : index
    %c0_94 = arith.constant 0 : index
    %148 = vector.load %arg10[%c2_92, %c0_93, %c0_94] : memref<4x8x32xbf16, #tpu.memory_space<vmem>>, vector<1x8x32xbf16>
    %149 = vector.shape_cast %148 : vector<1x8x32xbf16> to vector<8x32xbf16>
    %cst_95 = arith.constant dense<0.000000e+00> : vector<8x32xf32>
    %150 = tpu.matmul %147, %149, %cst_95 {dimension_numbers = #tpu.dot_dimension_numbers<[1], [0], [0], [1], [0, 0, 1, 1], [], []>} : vector<8x8xbf16>, vector<8x32xbf16>, vector<8x32xf32> -> vector<8x32xf32>
    %151 = arith.addf %109, %150 : vector<8x32xf32>
    %c3 = arith.constant 3 : index
    %c0_96 = arith.constant 0 : index
    %c0_97 = arith.constant 0 : index
    %152 = vector.load %arg4[%c3, %c0_96, %c0_97] : memref<4x32x8xbf16, #tpu.memory_space<vmem>>, vector<1x32x8xbf16>
    %153 = vector.shape_cast %152 : vector<1x32x8xbf16> to vector<32x8xbf16>
    %cst_98 = arith.constant dense<0.000000e+00> : vector<8x8xf32>
    %154 = tpu.matmul %24, %153, %cst_98 {dimension_numbers = #tpu.dot_dimension_numbers<[1], [0], [0], [1], [0, 0, 1, 1], [], []>} : vector<8x32xbf16>, vector<32x8xbf16>, vector<8x8xf32> -> vector<8x8xf32>
    %c3_99 = arith.constant 3 : index
    %c0_100 = arith.constant 0 : index
    %c0_101 = arith.constant 0 : index
    %155 = vector.load %arg5[%c3_99, %c0_100, %c0_101] : memref<4x1x8xf32, #tpu.memory_space<vmem>>, vector<1x1x8xf32>
    %156 = vector.shape_cast %155 : vector<1x1x8xf32> to vector<1x8xf32>
    %157 = vector.broadcast %156 : vector<1x8xf32> to vector<8x8xf32>
    %158 = arith.addf %154, %157 : vector<8x8xf32>
    %c3_102 = arith.constant 3 : index
    %c0_103 = arith.constant 0 : index
    %c0_104 = arith.constant 0 : index
    %159 = vector.load %arg6[%c3_102, %c0_103, %c0_104] : memref<4x32x8xbf16, #tpu.memory_space<vmem>>, vector<1x32x8xbf16>
    %160 = vector.shape_cast %159 : vector<1x32x8xbf16> to vector<32x8xbf16>
    %cst_105 = arith.constant dense<0.000000e+00> : vector<8x8xf32>
    %161 = tpu.matmul %24, %160, %cst_105 {dimension_numbers = #tpu.dot_dimension_numbers<[1], [0], [0], [1], [0, 0, 1, 1], [], []>} : vector<8x32xbf16>, vector<32x8xbf16>, vector<8x8xf32> -> vector<8x8xf32>
    %c3_106 = arith.constant 3 : index
    %c0_107 = arith.constant 0 : index
    %c0_108 = arith.constant 0 : index
    %162 = vector.load %arg7[%c3_106, %c0_107, %c0_108] : memref<4x1x8xf32, #tpu.memory_space<vmem>>, vector<1x1x8xf32>
    %163 = vector.shape_cast %162 : vector<1x1x8xf32> to vector<1x8xf32>
    %164 = vector.broadcast %163 : vector<1x8xf32> to vector<8x8xf32>
    %165 = arith.addf %161, %164 : vector<8x8xf32>
    %c3_109 = arith.constant 3 : index
    %c0_110 = arith.constant 0 : index
    %c0_111 = arith.constant 0 : index
    %166 = vector.load %arg8[%c3_109, %c0_110, %c0_111] : memref<4x32x8xbf16, #tpu.memory_space<vmem>>, vector<1x32x8xbf16>
    %167 = vector.shape_cast %166 : vector<1x32x8xbf16> to vector<32x8xbf16>
    %cst_112 = arith.constant dense<0.000000e+00> : vector<8x8xf32>
    %168 = tpu.matmul %24, %167, %cst_112 {dimension_numbers = #tpu.dot_dimension_numbers<[1], [0], [0], [1], [0, 0, 1, 1], [], []>} : vector<8x32xbf16>, vector<32x8xbf16>, vector<8x8xf32> -> vector<8x8xf32>
    %c3_113 = arith.constant 3 : index
    %c0_114 = arith.constant 0 : index
    %c0_115 = arith.constant 0 : index
    %169 = vector.load %arg9[%c3_113, %c0_114, %c0_115] : memref<4x1x8xf32, #tpu.memory_space<vmem>>, vector<1x1x8xf32>
    %170 = vector.shape_cast %169 : vector<1x1x8xf32> to vector<1x8xf32>
    %171 = vector.broadcast %170 : vector<1x8xf32> to vector<8x8xf32>
    %172 = arith.addf %168, %171 : vector<8x8xf32>
    %173 = arith.truncf %158 : vector<8x8xf32> to vector<8x8xbf16>
    %174 = arith.truncf %165 : vector<8x8xf32> to vector<8x8xbf16>
    %175 = arith.truncf %172 : vector<8x8xf32> to vector<8x8xbf16>
    %cst_116 = arith.constant dense<0.000000e+00> : vector<8x8xf32>
    %176 = tpu.matmul %173, %174, %cst_116 {dimension_numbers = #tpu.dot_dimension_numbers<[1], [1], [0], [0], [0, 0, 1, 0], [], []>} : vector<8x8xbf16>, vector<8x8xbf16>, vector<8x8xf32> -> vector<8x8xf32>
    %cst_117 = arith.constant dense<0xFF800000> : vector<8xf32>
    %177 = vector.multi_reduction <maximumf>, %176, %cst_117 [1] : vector<8x8xf32> to vector<8xf32>
    %178 = vector.shape_cast %177 : vector<8xf32> to vector<8x1xf32>
    %179 = vector.broadcast %178 : vector<8x1xf32> to vector<8x8xf32>
    %180 = arith.subf %176, %179 : vector<8x8xf32>
    %181 = math.exp %180 : vector<8x8xf32>
    %cst_118 = arith.constant dense<0.000000e+00> : vector<8xf32>
    %182 = vector.multi_reduction <add>, %181, %cst_118 [1] : vector<8x8xf32> to vector<8xf32>
    %183 = vector.shape_cast %182 : vector<8xf32> to vector<8x1xf32>
    %184 = arith.truncf %181 : vector<8x8xf32> to vector<8x8xbf16>
    %cst_119 = arith.constant dense<0.000000e+00> : vector<8x8xf32>
    %185 = tpu.matmul %184, %175, %cst_119 {dimension_numbers = #tpu.dot_dimension_numbers<[1], [0], [0], [1], [0, 0, 1, 1], [], []>} : vector<8x8xbf16>, vector<8x8xbf16>, vector<8x8xf32> -> vector<8x8xf32>
    %186 = tpu.reciprocal %183 {approx = true} : vector<8x1xf32> -> vector<8x1xf32>
    %187 = vector.broadcast %186 : vector<8x1xf32> to vector<8x8xf32>
    %188 = arith.mulf %185, %187 : vector<8x8xf32>
    %189 = arith.truncf %188 : vector<8x8xf32> to vector<8x8xbf16>
    %c3_120 = arith.constant 3 : index
    %c0_121 = arith.constant 0 : index
    %c0_122 = arith.constant 0 : index
    %190 = vector.load %arg10[%c3_120, %c0_121, %c0_122] : memref<4x8x32xbf16, #tpu.memory_space<vmem>>, vector<1x8x32xbf16>
    %191 = vector.shape_cast %190 : vector<1x8x32xbf16> to vector<8x32xbf16>
    %cst_123 = arith.constant dense<0.000000e+00> : vector<8x32xf32>
    %192 = tpu.matmul %189, %191, %cst_123 {dimension_numbers = #tpu.dot_dimension_numbers<[1], [0], [0], [1], [0, 0, 1, 1], [], []>} : vector<8x8xbf16>, vector<8x32xbf16>, vector<8x32xf32> -> vector<8x32xf32>
    %193 = arith.addf %151, %192 : vector<8x32xf32>
    %194 = arith.addf %1, %193 : vector<8x32xf32>
    %c0_124 = arith.constant 0 : index
    %c0_125 = arith.constant 0 : index
    %195 = vector.load %arg11[%c0_124, %c0_125] : memref<1x32xf32, #tpu.memory_space<vmem>>, vector<1x32xf32>
    %196 = vector.broadcast %195 : vector<1x32xf32> to vector<8x32xf32>
    %197 = arith.addf %194, %196 : vector<8x32xf32>
    %c0_126 = arith.constant 0 : index
    %c0_127 = arith.constant 0 : index
    %198 = vector.load %arg12[%c0_126, %c0_127] : memref<1x32xf32, #tpu.memory_space<vmem>>, vector<1x32xf32>
    %c0_128 = arith.constant 0 : index
    %c0_129 = arith.constant 0 : index
    %199 = vector.load %arg13[%c0_128, %c0_129] : memref<1x32xf32, #tpu.memory_space<vmem>>, vector<1x32xf32>
    %cst_130 = arith.constant dense<0.000000e+00> : vector<8xf32>
    %200 = vector.multi_reduction <add>, %197, %cst_130 [1] : vector<8x32xf32> to vector<8xf32>
    %201 = vector.shape_cast %200 : vector<8xf32> to vector<8x1xf32>
    %cst_131 = arith.constant 3.200000e+01 : f32
    %202 = vector.broadcast %cst_131 : f32 to vector<8x1xf32>
    %203 = arith.divf %201, %202 : vector<8x1xf32>
    %204 = vector.broadcast %203 : vector<8x1xf32> to vector<8x32xf32>
    %205 = arith.subf %197, %204 : vector<8x32xf32>
    %206 = arith.mulf %205, %205 : vector<8x32xf32>
    %cst_132 = arith.constant dense<0.000000e+00> : vector<8xf32>
    %207 = vector.multi_reduction <add>, %206, %cst_132 [1] : vector<8x32xf32> to vector<8xf32>
    %208 = vector.shape_cast %207 : vector<8xf32> to vector<8x1xf32>
    %cst_133 = arith.constant 3.200000e+01 : f32
    %209 = vector.broadcast %cst_133 : f32 to vector<8x1xf32>
    %210 = arith.divf %208, %209 : vector<8x1xf32>
    %cst_134 = arith.constant 9.99999997E-7 : f32
    %211 = vector.broadcast %cst_134 : f32 to vector<8x1xf32>
    %212 = arith.addf %210, %211 : vector<8x1xf32>
    %213 = math.rsqrt %212 : vector<8x1xf32>
    %214 = vector.broadcast %213 : vector<8x1xf32> to vector<8x32xf32>
    %215 = arith.mulf %205, %214 : vector<8x32xf32>
    %216 = vector.broadcast %198 : vector<1x32xf32> to vector<8x32xf32>
    %217 = arith.mulf %215, %216 : vector<8x32xf32>
    %218 = vector.broadcast %199 : vector<1x32xf32> to vector<8x32xf32>
    %219 = arith.addf %217, %218 : vector<8x32xf32>
    %220 = arith.truncf %219 : vector<8x32xf32> to vector<8x32xbf16>
    %c0_135 = arith.constant 0 : index
    %c0_136 = arith.constant 0 : index
    %221 = vector.load %arg14[%c0_135, %c0_136] : memref<32x128xbf16, #tpu.memory_space<vmem>>, vector<32x128xbf16>
    %cst_137 = arith.constant dense<0.000000e+00> : vector<8x128xf32>
    %222 = tpu.matmul %220, %221, %cst_137 {dimension_numbers = #tpu.dot_dimension_numbers<[1], [0], [0], [1], [0, 0, 1, 1], [], []>} : vector<8x32xbf16>, vector<32x128xbf16>, vector<8x128xf32> -> vector<8x128xf32>
    %c0_138 = arith.constant 0 : index
    %c0_139 = arith.constant 0 : index
    %223 = vector.load %arg15[%c0_138, %c0_139] : memref<1x128xf32, #tpu.memory_space<vmem>>, vector<1x128xf32>
    %224 = vector.broadcast %223 : vector<1x128xf32> to vector<8x128xf32>
    %225 = arith.addf %222, %224 : vector<8x128xf32>
    %cst_140 = arith.constant 5.000000e-01 : f32
    %226 = vector.broadcast %cst_140 : f32 to vector<8x128xf32>
    %227 = arith.mulf %226, %225 : vector<8x128xf32>
    %228 = arith.mulf %225, %225 : vector<8x128xf32>
    %229 = arith.mulf %228, %225 : vector<8x128xf32>
    %cst_141 = arith.constant 4.471500e-02 : f32
    %230 = vector.broadcast %cst_141 : f32 to vector<8x128xf32>
    %231 = arith.mulf %230, %229 : vector<8x128xf32>
    %232 = arith.addf %225, %231 : vector<8x128xf32>
    %cst_142 = arith.constant 0.797884583 : f32
    %233 = vector.broadcast %cst_142 : f32 to vector<8x128xf32>
    %234 = arith.mulf %233, %232 : vector<8x128xf32>
    %235 = math.tanh %234 : vector<8x128xf32>
    %cst_143 = arith.constant 1.000000e+00 : f32
    %236 = vector.broadcast %cst_143 : f32 to vector<8x128xf32>
    %237 = arith.addf %236, %235 : vector<8x128xf32>
    %238 = arith.mulf %227, %237 : vector<8x128xf32>
    %239 = arith.truncf %238 : vector<8x128xf32> to vector<8x128xbf16>
    %c0_144 = arith.constant 0 : index
    %c0_145 = arith.constant 0 : index
    %240 = vector.load %arg16[%c0_144, %c0_145] : memref<128x32xbf16, #tpu.memory_space<vmem>>, vector<128x32xbf16>
    %cst_146 = arith.constant dense<0.000000e+00> : vector<8x32xf32>
    %241 = tpu.matmul %239, %240, %cst_146 {dimension_numbers = #tpu.dot_dimension_numbers<[1], [0], [0], [1], [0, 0, 1, 1], [], []>} : vector<8x128xbf16>, vector<128x32xbf16>, vector<8x32xf32> -> vector<8x32xf32>
    %c0_147 = arith.constant 0 : index
    %c0_148 = arith.constant 0 : index
    %242 = vector.load %arg17[%c0_147, %c0_148] : memref<1x32xf32, #tpu.memory_space<vmem>>, vector<1x32xf32>
    %243 = vector.broadcast %242 : vector<1x32xf32> to vector<8x32xf32>
    %244 = arith.addf %241, %243 : vector<8x32xf32>
    %245 = arith.addf %197, %244 : vector<8x32xf32>
    %246 = vector.shape_cast %245 : vector<8x32xf32> to vector<1x8x32xf32>
    %c0_149 = arith.constant 0 : index
    %c0_150 = arith.constant 0 : index
    %c0_151 = arith.constant 0 : index
    %247 = vector.load %arg18[%c0_149, %c0_150, %c0_151] : memref<1x8x32xf32, #tpu.memory_space<vmem>>, vector<1x8x32xf32>
    tpu.vector_store %arg18[%c0_149, %c0_150, %c0_151], %246 {strides = array<i32>} : memref<1x8x32xf32, #tpu.memory_space<vmem>>, vector<1x8x32xf32>,
    return
  }
  func.func @transform_0(%arg0: i32) -> (i32, i32, i32) {
    %c0_i32 = arith.constant 0 : i32
    %c0_i32_0 = arith.constant 0 : i32
    %c0_i32_1 = arith.constant 0 : i32
    return %arg0, %c0_i32, %c0_i32_0 : i32, i32, i32
  }
  func.func @transform_1(%arg0: i32) -> (i32, i32) {
    %c0_i32 = arith.constant 0 : i32
    %c0_i32_0 = arith.constant 0 : i32
    %c0_i32_1 = arith.constant 0 : i32
    return %c0_i32, %c0_i32_0 : i32, i32
  }
  func.func @transform_2(%arg0: i32) -> (i32, i32) {
    %c0_i32 = arith.constant 0 : i32
    %c0_i32_0 = arith.constant 0 : i32
    %c0_i32_1 = arith.constant 0 : i32
    return %c0_i32, %c0_i32_0 : i32, i32
  }
  func.func @transform_3(%arg0: i32) -> (i32, i32, i32) {
    %c0_i32 = arith.constant 0 : i32
    %c0_i32_0 = arith.constant 0 : i32
    %c0_i32_1 = arith.constant 0 : i32
    %c0_i32_2 = arith.constant 0 : i32
    return %c0_i32, %c0_i32_0, %c0_i32_1 : i32, i32, i32
  }
  func.func @transform_4(%arg0: i32) -> (i32, i32, i32) {
    %c0_i32 = arith.constant 0 : i32
    %c0_i32_0 = arith.constant 0 : i32
    %c0_i32_1 = arith.constant 0 : i32
    %c0_i32_2 = arith.constant 0 : i32
    return %c0_i32, %c0_i32_0, %c0_i32_1 : i32, i32, i32
  }
  func.func @transform_5(%arg0: i32) -> (i32, i32, i32) {
    %c0_i32 = arith.constant 0 : i32
    %c0_i32_0 = arith.constant 0 : i32
    %c0_i32_1 = arith.constant 0 : i32
    %c0_i32_2 = arith.constant 0 : i32
    return %c0_i32, %c0_i32_0, %c0_i32_1 : i32, i32, i32
  }
  func.func @transform_6(%arg0: i32) -> (i32, i32, i32) {
    %c0_i32 = arith.constant 0 : i32
    %c0_i32_0 = arith.constant 0 : i32
    %c0_i32_1 = arith.constant 0 : i32
    %c0_i32_2 = arith.constant 0 : i32
    return %c0_i32, %c0_i32_0, %c0_i32_1 : i32, i32, i32
  }
  func.func @transform_7(%arg0: i32) -> (i32, i32, i32) {
    %c0_i32 = arith.constant 0 : i32
    %c0_i32_0 = arith.constant 0 : i32
    %c0_i32_1 = arith.constant 0 : i32
    %c0_i32_2 = arith.constant 0 : i32
    return %c0_i32, %c0_i32_0, %c0_i32_1 : i32, i32, i32
  }
  func.func @transform_8(%arg0: i32) -> (i32, i32, i32) {
    %c0_i32 = arith.constant 0 : i32
    %c0_i32_0 = arith.constant 0 : i32
    %c0_i32_1 = arith.constant 0 : i32
    %c0_i32_2 = arith.constant 0 : i32
    return %c0_i32, %c0_i32_0, %c0_i32_1 : i32, i32, i32
  }
  func.func @transform_9(%arg0: i32) -> (i32, i32, i32) {
    %c0_i32 = arith.constant 0 : i32
    %c0_i32_0 = arith.constant 0 : i32
    %c0_i32_1 = arith.constant 0 : i32
    %c0_i32_2 = arith.constant 0 : i32
    return %c0_i32, %c0_i32_0, %c0_i32_1 : i32, i32, i32
  }
  func.func @transform_10(%arg0: i32) -> (i32, i32) {
    %c0_i32 = arith.constant 0 : i32
    %c0_i32_0 = arith.constant 0 : i32
    %c0_i32_1 = arith.constant 0 : i32
    return %c0_i32, %c0_i32_0 : i32, i32
  }
  func.func @transform_11(%arg0: i32) -> (i32, i32) {
    %c0_i32 = arith.constant 0 : i32
    %c0_i32_0 = arith.constant 0 : i32
    %c0_i32_1 = arith.constant 0 : i32
    return %c0_i32, %c0_i32_0 : i32, i32
  }
  func.func @transform_12(%arg0: i32) -> (i32, i32) {
    %c0_i32 = arith.constant 0 : i32
    %c0_i32_0 = arith.constant 0 : i32
    %c0_i32_1 = arith.constant 0 : i32
    return %c0_i32, %c0_i32_0 : i32, i32
  }
  func.func @transform_13(%arg0: i32) -> (i32, i32) {
    %c0_i32 = arith.constant 0 : i32
    %c0_i32_0 = arith.constant 0 : i32
    %c0_i32_1 = arith.constant 0 : i32
    return %c0_i32, %c0_i32_0 : i32, i32
  }
  func.func @transform_14(%arg0: i32) -> (i32, i32) {
    %c0_i32 = arith.constant 0 : i32
    %c0_i32_0 = arith.constant 0 : i32
    %c0_i32_1 = arith.constant 0 : i32
    return %c0_i32, %c0_i32_0 : i32, i32
  }
  func.func @transform_15(%arg0: i32) -> (i32, i32) {
    %c0_i32 = arith.constant 0 : i32
    %c0_i32_0 = arith.constant 0 : i32
    %c0_i32_1 = arith.constant 0 : i32
    return %c0_i32, %c0_i32_0 : i32, i32
  }
  func.func @transform_16(%arg0: i32) -> (i32, i32) {
    %c0_i32 = arith.constant 0 : i32
    %c0_i32_0 = arith.constant 0 : i32
    %c0_i32_1 = arith.constant 0 : i32
    return %c0_i32, %c0_i32_0 : i32, i32
  }
  func.func @transform_17(%arg0: i32) -> (i32, i32, i32) {
    %c0_i32 = arith.constant 0 : i32
    %c0_i32_0 = arith.constant 0 : i32
    %c0_i32_1 = arith.constant 0 : i32
    return %arg0, %c0_i32, %c0_i32_0 : i32, i32, i32
  }
}

</mosaic_0001>

<bundles_post_ra>
// kernel: block_forward.1
= control target key start
LH: loop header
LB: loop body
LE: loop exit
PB: predicated region body
PF: predicated region fallthrough
CT: control target
= control target key end

     0   :  { %s3387_s0 = inlined_call_operand.vmem [shape: f32[2,8,32], index: 0, kind: input, shape index: {}]   ;;  %s3388_s1 = inlined_call_operand.vmem [shape: f32[1,32], index: 1, kind: input, shape index: {}]   ;;  %s3389_s2 = inlined_call_operand.vmem [shape: f32[1,32], index: 2, kind: input, shape index: {}]   ;;  %s3390_s3 = inlined_call_operand.vmem [shape: bf16[4,32,8], index: 3, kind: input, shape index: {}]   ;;  %s3391_s4 = inlined_call_operand.vmem [shape: f32[4,1,8], index: 4, kind: input, shape index: {}]   ;;  %s3392_s5 = inlined_call_operand.vmem [shape: bf16[4,32,8], index: 5, kind: input, shape index: {}]   ;;  %s3393_s6 = inlined_call_operand.vmem [shape: f32[4,1,8], index: 6, kind: input, shape index: {}]   ;;  %s3394_s7 = inlined_call_operand.vmem [shape: bf16[4,32,8], index: 7, kind: input, shape index: {}]   ;;  %s3395_s8 = inlined_call_operand.vmem [shape: f32[4,1,8], index: 8, kind: input, shape index: {}]   ;;  %s3396_s9 = inlined_call_operand.vmem [shape: bf16[4,8,32], index: 9, kind: input, shape index: {}]   ;;  %s3397_s10 = inlined_call_operand.vmem [shape: f32[1,32], index: 10, kind: input, shape index: {}]   ;;  %s3398_s11 = inlined_call_operand.vmem [shape: f32[1,32], index: 11, kind: input, shape index: {}]   ;;  %s3399_s12 = inlined_call_operand.vmem [shape: f32[1,32], index: 12, kind: input, shape index: {}]   ;;  %s3400_s13 = inlined_call_operand.vmem [shape: bf16[32,128], index: 13, kind: input, shape index: {}]   ;;  %s3401_s14 = inlined_call_operand.vmem [shape: f32[1,128], index: 14, kind: input, shape index: {}]   ;;  %s3402_s15 = inlined_call_operand.vmem [shape: bf16[128,32], index: 15, kind: input, shape index: {}]   ;;  %s3403_s16 = inlined_call_operand.vmem [shape: f32[1,32], index: 16, kind: input, shape index: {}]   ;;  %s3404_s17 = inlined_call_operand.hbm [shape: f32[2,8,32], index: 17, kind: output, shape index: {}]  }
   0x1   :  { %3406 = sst [smem:[#allocation7_spill]] %s3387_s0 }
   0x2   :  { %3407 = sst [smem:[#allocation8_spill]] %s3388_s1 }
   0x3   :  { %3408 = sst [smem:[#allocation9_spill]] %s3389_s2 }
   0x4   :  { %3409 = sst [smem:[#allocation10_spill]] %s3390_s3 }
   0x5   :  { %3410 = sst [smem:[#allocation11_spill]] %s3391_s4 }
   0x6   :  { %22 = vsyncpa [#allocation3], 0 }
   0x7   :  { %24 = vsyncpa [#allocation3 + $0x1], 0  ;;  %s2941_s24 = smov 0   ;;  %s2943_s25 = smov 0  }
   0x8   :  { %s2945_s26 = smov 0   ;;  %s2947_s27 = smov 0  }
   0x9 LB: > { %3411 = sst [smem:[#allocation5_spill]] %s2842_s26  ;;  %s2962_s28 = sadd.s32 4294967295, %s2846_s27   ;;  %s2846_s27 = sphi %s2947_s27, %s3424_s27   ;;  %s2842_s26 = sphi %s2945_s26, %s3421_s26   ;;  %s2838_s25 = sphi %s2943_s25, %s3423_s25   ;;  %s2834_s24 = sphi %s2941_s24, %s3422_s24  }
   0xa   : > { %s2283_s29 = sadd.s32 4294967294, %s2846_s27   ;;  %s2966_s0 = sadd.s32 1, %s2846_s27  }
   0xb   : > { %s399_s30 = sadd.s32 1, %s2842_s26  ;;  %s396_s18 = ssub.s32 %s2846_s27, %s2966_s0 }
   0xc   : > { %p409_p0 = scmp.ne.s32.totalorder %s2842_s26, %s2838_s25  ;;  %p397_p1 = scmp.eq.s32.totalorder %s396_s18, 0 }
   0xd   : > { %p410_p2 = scmp.eq.s32.totalorder %s2962_s28, 1  ;;  %p415_p3 = scmp.ne.s32.totalorder %s2838_s25, %s2834_s24 }
   0xe   : > { %p416_p4 = scmp.eq.s32.totalorder %s2283_s29, 1  ;;  %p2286_p7 = scmp.ge.s32.totalorder %s2846_s27, 1 }
   0xf   : > { %s2977_s19 = scalar_select %p397_p1, %s2842_s26, %s399_s30  }
  0x10   : > { %p2979_p5 = por %p410_p2, %p409_p0  ;;  %p2983_p6 = por %p416_p4, %p415_p3 }
  0x11   : > { %3412 = sst [smem:[#allocation6_spill]] %s2977_s19  ;;  %p489_p8 = scmp.lt.s32.totalorder %s2846_s27, 3 }
  0x13   : > { %p490_p9 = pnand %p2286_p7, %p489_p8 }
  0x14   : > { %p540_p10 = scmp.lt.s32.totalorder (!%p490_p9), %s2962_s28, 1  ;;  %vm548_vm0 = vcmask (!%p490_p9), 261120   ;;  %s3415_s30 = sld [smem:[#allocation7_spill]] (!%p490_p9)  ;;  %v2848_v8 = vmov (!%p490_p9), 0.0   ;;  %vm2849_vm1 = vmmov (!%p490_p9), 0   ;;  %v2730_v19 = vld [vmem:[%s3392_s5] sm:$0xff] (!%p490_p9)  }
  0x15   : > { %493 = sbr.rel (%p490_p9) target bundleno = 4408 (0x1138), region = 88  ;;  %s3416_s3 = sld [smem:[#allocation10_spill]] (!%p490_p9)  ;;  %2491 = vmatprep.subr.bf16.mxu0 (!%p490_p9), %v2848_v8  ;;  %2515 = vmatprep.subr.bf16.mxu1 (!%p490_p9), %v2848_v8  ;;  %v2731_v21 = vld [vmem:[%s3392_s5 + $0x8] sm:$0xff] (!%p490_p9)   ;;  %v2732_v22 = vld [vmem:[%s3394_s7] sm:$0xff] (!%p490_p9)   ;;  %vm773_vm2 = vcmask (!%p490_p9), 64512   ;;  %vm833_vm3 = vcmask (!%p490_p9), 1043456  }
  0x16   : > { %2495 = vmatprep.mubr.msk.bf16.mxu0 (!%p490_p9), %vm2849_vm1, %v2848_v8  ;;  %2517 = vmatprep.mubr.msk.bf16.mxu1 (!%p490_p9), %vm2849_vm1, %v2848_v8  ;;  %s3418_s2 = sld [smem:[#allocation9_spill]] (!%p490_p9)  ;;  %v2733_v23 = vld [vmem:[%s3394_s7 + $0x8] sm:$0xff] (!%p490_p9)   ;;  %v2295_v28 = vld [vmem:[%s3393_s6] ss:$0 sm:$0xff] (!%p490_p9)  ;;  %s3419_s4 = sld [smem:[#allocation11_spill]] (!%p490_p9)  ;;  %v2736_v49 = vld [vmem:[%s3394_s7 + $0x10] sm:$0xff] (!%p490_p9)  }
  0x17   : > { %v2299_v37 = vld [vmem:[%s3395_s8] ss:$0 sm:$0xff] (!%p490_p9)  ;;  %v2737_v50 = vld [vmem:[%s3394_s7 + $0x18] sm:$0xff] (!%p490_p9)   ;;  %v2328_v60 = vld [vmem:[%s3395_s8 + $0x1] ss:$0 sm:$0xff] (!%p490_p9)  ;;  %s537_s26 = sand.u32 (!%p490_p9), 1, %s2838_s25  }
  0x18   : > { %s2416_s29 = sshll.u32 (!%p490_p9), %s2962_s28, 7  ;;  %s2850_s23 = smov (!%p490_p9), [#allocation2]  }
  0x19   : > { %s2788_s19 = sshll.u32 (!%p490_p9), %s2850_s23, 4  ;;  %s2789_s19 = int_to_ptr.vmem [resolvable:$false] %s2788_s19 }
  0x1b   : > { %v2728_v7 = vld [vmem:[%s3416_s3] sm:$0xff] (!%p490_p9)   ;;  %v2729_v9 = vld [vmem:[%s3416_s3 + $0x8] sm:$0xff] (!%p490_p9)   ;;  %v2734_v43 = vld [vmem:[%s3416_s3 + $0x10] sm:$0xff] (!%p490_p9)  }
  0x1c   : > { %s541_s21 = scalar_select %p540_p10, %s2962_s28, 1  ;;  %2492 = vmatpush3.bf16.msra.mxu0 %v2728_v7  ;;  %v2290_v16 = vld [vmem:[%s3418_s2] ss:$0 sm:$0xff]  ;;  %v2735_v48 = vld [vmem:[%s3416_s3 + $0x18] sm:$0xff]  }
  0x1d   : > { %2493 = vmatprep.subr.bf16.mxu0 %v2848_v8  ;;  %v2291_v35 = vld [vmem:[%s3419_s4] ss:$0 sm:$0xff]  ;;  %s2211_s28 = scalar_lea.sflag [#allocation3], %s537_s26 }
  0x1e   : > { %s2288_s22 = sshll.u32 %s541_s21, 3 }
  0x1f   : > { %s543_s18 = scalar_lea.vmem %s3415_s30, %s2288_s22  ;;  %s3417_s30 = sld [smem:[#allocation8_spill]] }
  0x20   : > { %v2994_v0 = vld [vmem:[%s543_s18] sm:$0xff]  ;;  %2494 = vmatpush3.bf16.msra.mxu0 %v2729_v9  ;;  %s2287_s22 = sshll.u32 %s537_s26, 3 }
  0x21   : > { %v549_v1 = vsel %vm548_vm0, %v2994_v0, 0.0  ;;  %2499 = vmatprep.subr.bf16.mxu0 %v2848_v8 }
  0x22   : > { %550 = vadd.xlane.f32.xlu0 %v549_v1 }
  0x25   : > { %v2289_v14 = vld [vmem:[%s3417_s30] ss:$0 sm:$0xff]  ;;  %s539_s30 = scalar_lea.vmem [#allocation2], %s2287_s22 }
  0x26   : > { %s2224_s18 = sshll.u32 %s539_s30, 4  ;;  %s3346_s18 = int_to_ptr.vmem [resolvable:$true] %s2224_s18 }
  0x27   : > { %s2784_s22 = scalar_lea.vmem %s3346_s18, 128  ;;  %p2791_p0 = scmp.lt.s32.totalorder %s3346_s18, %s2789_s19 }
  0x28   : > { %p2785_p11 = scmp.ne.s32.totalorder %s3346_s18, %s2784_s22 }
  0x2a   : > { %p2786_p12 = pnand %p2785_p11, %p2979_p5 }
  0x2c   : > { %p2787_p13 = pneg %p2786_p12 }
  0xaf   : > { %v551_v2 = vpop.xlane.xlu0 %550 }
  0xb0   : > { %v553_v3 = vmul.f32 0.03125, %v551_v2 }
  0xb2   : > { %v554_v4 = vsub.f32 %v2994_v0, %v553_v3 }
  0xb4   : > { %v555_v5 = vmul.f32 %v554_v4, %v554_v4 }
  0xb6   : > { %v556_v6 = vsel %vm548_vm0, %v555_v5, 0.0 }
  0xb7   : > { %557 = vadd.xlane.f32.xlu0 %v556_v6 }
 0x144   : > { %v558_v10 = vpop.xlane.xlu0 %557 }
 0x145   : > { %v559_v11 = vmul.f32 0.03125, %v558_v10  ;;  %v2738_v10 = vld [vmem:[%s3392_s5 + $0x10] sm:$0xff]  }
 0x147   : > { %v560_v12 = vadd.f32 1e-06, %v559_v11 }
 0x149   : > { %2762 = vrsqrt.f32 %v560_v12 }
 0x153   : > { %v2763_v13 = vpop.eup %2762 }
 0x154   : > { %v562_v15 = vmul.f32 %v2763_v13, %v554_v4  ;;  %v2739_v13 = vld [vmem:[%s3392_s5 + $0x18] sm:$0xff]  }
 0x156   : > { %v569_v17 = vmul.f32 %v2289_v14, %v562_v15 }
 0x158   : > { %v576_v18 = vadd.f32 %v2290_v16, %v569_v17 }
 0x15a   : > { %v3023_v20 = vpack.c.bf16 %v576_v18, %v576_v18  ;;  %v2319_v18 = vld [vmem:[%s3393_s6 + $0x1] ss:$0 sm:$0xff] }
 0x15c   : > { %2496 = vmatmul.mubr.msk.bf16.vlgmr.msra.gmra.mrb[0].mxu0 %vm548_vm0, %v3023_v20 }
 0x15d   : > { %2500 = vmatpush3.bf16.msra.mxu0 %v2730_v19  ;;  %2503 = vmatprep.mubr.msk.bf16.mxu0 %vm2849_vm1, %v2848_v8 }
 0x15e   : > { %2501 = vmatprep.subr.bf16.mxu0 %v2848_v8 }
 0x161   : > { %2502 = vmatpush3.bf16.msra.mxu0 %v2731_v21 }
 0x162   : > { %2507 = vmatprep.subr.bf16.mxu0 %v2848_v8 }
 0x164   : > { %2504 = vmatmul.mubr.msk.bf16.vlgmr.msra.gmra.mrb[4].mxu0 %vm548_vm0, %v3023_v20 }
 0x165   : > { %2508 = vmatpush3.bf16.msra.mxu0 %v2732_v22  ;;  %2511 = vmatprep.mubr.msk.bf16.mxu0 %vm2849_vm1, %v2848_v8 }
 0x166   : > { %2509 = vmatprep.subr.bf16.mxu0 %v2848_v8 }
 0x169   : > { %2510 = vmatpush3.bf16.msra.mxu0 %v2733_v23 }
 0x16a   : > { %2521 = vmatprep.subr.bf16.mxu0 %v2848_v8 }
 0x16c   : > { %2512 = vmatmul.mubr.msk.bf16.vlgmr.msra.gmra.mrb[8].mxu0 %vm548_vm0, %v3023_v20 }
 0x16d   : > { %2523 = vmatprep.mubr.msk.bf16.mxu0 %vm2849_vm1, %v2848_v8 }
 0x22f   : > { %v638_v24 = vpop.f32.mrb[0].mxu0 }
 0x230   : > { %v2497_v25 = vpop.f32.mrb[1].mxu0  ;;  %v639_v38 = vadd.f32 %v2291_v35, %v638_v24 }
 0x231   : > { %v641_v26 = vpop.f32.mrb[2].mxu0 }
 0x232   : > { %v2498_v27 = vpop.f32.mrb[3].mxu0  ;;  %v770_v44 = vpack.c.bf16 %v639_v38, %v639_v38  ;;  %v2310_v26 = vld [vmem:[%s3419_s4 + $0x1] ss:$0 sm:$0xff] }
 0x237   : > { %v701_v29 = vpop.f32.mrb[4].mxu0 }
 0x238   : > { %v702_v30 = vadd.f32 %v2295_v28, %v701_v29  ;;  %v2505_v31 = vpop.f32.mrb[5].mxu0 }
 0x239   : > { %v704_v32 = vpop.f32.mrb[6].mxu0 }
 0x23a   : > { %v771_v33 = vpack.c.bf16 %v702_v30, %v702_v30  ;;  %v2506_v34 = vpop.f32.mrb[7].mxu0 }
 0x23c   : > { %v778_v36 = vsel %vm773_vm2, %v771_v33, 0 }
 0x23d   : > { %2516 = vmatpush3.bf16.xpose.msra.mxu1 %v778_v36 }
 0x23e   : > { %2527 = vmatprep.subr.bf16.mxu1 %v2848_v8 }
 0x23f   : > { %v764_v39 = vpop.f32.mrb[8].mxu0 }
 0x240   : > { %v765_v40 = vadd.f32 %v2299_v37, %v764_v39  ;;  %v2513_v41 = vpop.f32.mrb[9].mxu0  ;;  %v880_v39 = vld [vmem:[%s3396_s9] sm:$0xf] }
 0x241   : > { %v767_v42 = vpop.f32.mrb[10].mxu0 }
 0x242   : > { %v772_v45 = vpack.c.bf16 %v765_v40, %v765_v40  ;;  %v2514_v46 = vpop.f32.mrb[11].mxu0 }
 0x243   : > { %v2740_v46 = vld [vmem:[%s3392_s5 + $0x20] sm:$0xff]  }
 0x244   : > { %v835_v47 = vsel %vm833_vm3, %v772_v45, 0  ;;  %2518 = vmatmul.mubr.msk.bf16.vlgmr.msra.gmra.mrb[0].mxu1 %vm773_vm2, %v770_v44 }
 0x245   : > { %2522 = vmatpush3.bf16.msra.mxu0 %v835_v47  ;;  %2528 = vmatpush3.bf16.msra.mxu1 %v2734_v43  ;;  %v1236_v43 = vsel %vm833_vm3, %v880_v39, 0 }
 0x246   : > { %2529 = vmatprep.subr.bf16.mxu1 %v2848_v8  ;;  %2531 = vmatprep.mubr.msk.bf16.mxu1 %vm2849_vm1, %v2848_v8 }
 0x247   : > { %2535 = vmatprep.subr.bf16.mxu0 %v2848_v8 }
 0x249   : > { %2530 = vmatpush3.bf16.msra.mxu1 %v2735_v48  ;;  %v2741_v48 = vld [vmem:[%s3392_s5 + $0x28] sm:$0xff]  }
 0x24a   : > { %2543 = vmatprep.subr.bf16.mxu1 %v2848_v8 }
 0x24c   : > { %2532 = vmatmul.mubr.msk.bf16.vlgmr.msra.gmra.mrb[4].mxu1 %vm548_vm0, %v3023_v20 }
 0x24d   : > { %2544 = vmatpush3.bf16.msra.mxu1 %v2736_v49  ;;  %2547 = vmatprep.mubr.msk.bf16.mxu1 %vm2849_vm1, %v2848_v8  ;;  %v2334_v49 = vld [vmem:[%s3396_s9 + $0x4] sm:$0xf] }
 0x24e   : > { %2545 = vmatprep.subr.bf16.mxu1 %v2848_v8 }
 0x251   : > { %2546 = vmatpush3.bf16.msra.mxu1 %v2737_v50  ;;  %v1190_v50 = vsel %vm833_vm3, %v2334_v49, 0  ;;  %v2366_v49 = vld [vmem:[%s3396_s9 + $0x8] sm:$0xf] }
 0x252   : > { %2557 = vmatprep.subr.bf16.mxu1 %v2848_v8 }
 0x254   : > { %2548 = vmatmul.mubr.msk.bf16.vlgmr.msra.gmra.mrb[8].mxu1 %vm548_vm0, %v3023_v20 }
 0x255   : > { %2559 = vmatprep.mubr.msk.bf16.mxu1 %vm2849_vm1, %v2848_v8 }
 0x317   : > { %v814_v51 = vpop.f32.mrb[0].mxu1 }
 0x318   : > { %v2519_v52 = vpop.f32.mrb[1].mxu1  ;;  %v820_v53 = vsel %vm773_vm2, %v814_v51, -inf }
 0x319   : > { %821 = vmax.xlane.f32.xlu1 %v820_v53  ;;  %v817_v54 = vpop.f32.mrb[2].mxu1 }
 0x31a   : > { %v2520_v55 = vpop.f32.mrb[3].mxu1 }
 0x31f   : > { %v940_v56 = vpop.f32.mrb[4].mxu1 }
 0x320   : > { %v2533_v57 = vpop.f32.mrb[5].mxu1  ;;  %v941_v28 = vadd.f32 %v2310_v26, %v940_v56  ;;  %v2360_v26 = vld [vmem:[%s3395_s8 + $0x2] ss:$0 sm:$0xff] }
 0x321   : > { %v943_v58 = vpop.f32.mrb[6].mxu1  ;;  %v2742_v57 = vld [vmem:[%s3416_s3 + $0x20] sm:$0xff]  }
 0x322   : > { %v2534_v59 = vpop.f32.mrb[7].mxu1  ;;  %v1076_v29 = vpack.c.bf16 %v941_v28, %v941_v28 }
 0x327   : > { %v1070_v61 = vpop.f32.mrb[8].mxu1 }
 0x328   : > { %v1071_v62 = vadd.f32 %v2328_v60, %v1070_v61  ;;  %v2549_v63 = vpop.f32.mrb[9].mxu1  ;;  %v2743_v60 = vld [vmem:[%s3416_s3 + $0x28] sm:$0xff]  }
 0x329   : > { %v1073_v1 = vpop.f32.mrb[10].mxu1 }
 0x32a   : > { %v1078_v2 = vpack.c.bf16 %v1071_v62, %v1071_v62  ;;  %v2550_v3 = vpop.f32.mrb[11].mxu1  ;;  %v2744_v1 = vld [vmem:[%s3394_s7 + $0x20] sm:$0xff]  }
 0x32b   : > { %v2351_v3 = vld [vmem:[%s3393_s6 + $0x2] ss:$0 sm:$0xff] }
 0x32c   : > { %v1139_v4 = vsel %vm833_vm3, %v1078_v2, 0 }
 0x32d   : > { %2558 = vmatpush3.bf16.msra.mxu1 %v1139_v4  ;;  %v2745_v4 = vld [vmem:[%s3394_s7 + $0x28] sm:$0xff]  }
 0x32e   : > { %2569 = vmatprep.subr.bf16.mxu1 %v2848_v8 }
 0x3a6   : > { %v822_v5 = vpop.xlane.xlu1 %821 }
 0x3a7   : > { %v823_v6 = vsub.f32 %v814_v51, %v822_v5 }
 0x3a9   : > { %v824_v7 = vmul.f32 1.442695, %v823_v6 }
 0x3ab   : > { %2764 = vpow2.f32 %v824_v7 }
 0x3b5   : > { %v2765_v9 = vpop.eup %2764 }
 0x3b6   : > { %v826_v11 = vsel %vm773_vm2, %v2765_v9, 0.0  ;;  %v829_v12 = vpack.c.bf16 %v2765_v9, %v2765_v9 }
 0x3b7   : > { %827 = vadd.xlane.f32.xlu0 %v826_v11 }
 0x3b8   : > { %2524 = vmatmul.mubr.msk.bf16.vlgmr.msra.gmra.mrb[12].mxu0 %vm773_vm2, %v829_v12 }
 0x3b9   : > { %2536 = vmatpush3.bf16.msra.mxu0 %v2738_v10  ;;  %2539 = vmatprep.mubr.msk.bf16.mxu0 %vm2849_vm1, %v2848_v8 }
 0x3ba   : > { %2537 = vmatprep.subr.bf16.mxu0 %v2848_v8 }
 0x3bd   : > { %2538 = vmatpush3.bf16.msra.mxu0 %v2739_v13 }
 0x3be   : > { %2551 = vmatprep.subr.bf16.mxu0 %v2848_v8 }
 0x3c0   : > { %2540 = vmatmul.mubr.msk.bf16.vlgmr.msra.gmra.mrb[16].mxu0 %vm548_vm0, %v3023_v20 }
 0x3c1   : > { %2553 = vmatprep.mubr.msk.bf16.mxu0 %vm2849_vm1, %v2848_v8 }
 0x444   : > { %v828_v38 = vpop.xlane.xlu0 %827 }
 0x48b   : > { %v871_v14 = vpop.f32.mrb[12].mxu0 }
 0x48c   : > { %v2525_v15 = vpop.f32.mrb[13].mxu0 }
 0x48d   : > { %v874_v16 = vpop.f32.mrb[14].mxu0 }
 0x48e   : > { %v2526_v17 = vpop.f32.mrb[15].mxu0 }
 0x493   : > { %v1005_v19 = vpop.f32.mrb[16].mxu0 }
 0x494   : > { %v1006_v21 = vadd.f32 %v2319_v18, %v1005_v19  ;;  %v2541_v22 = vpop.f32.mrb[17].mxu0  ;;  %v2342_v18 = vld [vmem:[%s3419_s4 + $0x2] ss:$0 sm:$0xff] }
 0x495   : > { %v1008_v23 = vpop.f32.mrb[18].mxu0 }
 0x496   : > { %v1077_v24 = vpack.c.bf16 %v1006_v21, %v1006_v21  ;;  %v2542_v25 = vpop.f32.mrb[19].mxu0 }
 0x498   : > { %v1083_v27 = vsel %vm773_vm2, %v1077_v24, 0 }
 0x499   : > { %2552 = vmatpush3.bf16.xpose.msra.mxu0 %v1083_v27 }
 0x49a   : > { %2563 = vmatprep.subr.bf16.mxu0 %v2848_v8 }
 0x4a0   : > { %2554 = vmatmul.mubr.msk.bf16.vlgmr.msra.gmra.mrb[20].mxu0 %vm773_vm2, %v1076_v29 }
 0x4a1   : > { %2565 = vmatprep.mubr.msk.bf16.mxu0 %vm2849_vm1, %v2848_v8  ;;  %2564 = vmatpush3.bf16.msra.mxu0 %v1190_v50  ;;  %v1587_v50 = vsel %vm833_vm3, %v2366_v49, 0 }
 0x4a2   : > { %2575 = vmatprep.subr.bf16.mxu0 %v2848_v8 }
 0x573   : > { %v1119_v30 = vpop.f32.mrb[20].mxu0 }
 0x574   : > { %v2555_v31 = vpop.f32.mrb[21].mxu0  ;;  %v1125_v32 = vsel %vm773_vm2, %v1119_v30, -inf }
 0x575   : > { %1126 = vmax.xlane.f32.xlu1 %v1125_v32  ;;  %v1122_v33 = vpop.f32.mrb[22].mxu0 }
 0x576   : > { %v2556_v34 = vpop.f32.mrb[23].mxu0 }
 0x602   : > { %v1127_v35 = vpop.xlane.xlu1 %1126 }
 0x603   : > { %v1128_v36 = vsub.f32 %v1119_v30, %v1127_v35 }
 0x605   : > { %v1129_v37 = vmul.f32 1.442695, %v1128_v36 }
 0x607   : > { %2766 = vpow2.f32 %v1129_v37 }
 0x608   : > { %2768 = vrcp.f32 %v828_v38 }
 0x611   : > { %v2767_v40 = vpop.eup %2766 }
 0x612   : > { %v1131_v41 = vsel %vm773_vm2, %v2767_v40, 0.0  ;;  %v1134_v42 = vpack.c.bf16 %v2767_v40, %v2767_v40  ;;  %v2769_v44 = vpop.eup %2768 }
 0x613   : > { %1132 = vadd.xlane.f32.xlu1 %v1131_v41  ;;  %v878_v45 = vmul.f32 %v2769_v44, %v871_v14 }
 0x614   : > { %2560 = vmatmul.mubr.msk.bf16.vlgmr.msra.gmra.mrb[12].mxu1 %vm773_vm2, %v1134_v42 }
 0x615   : > { %2570 = vmatpush3.bf16.msra.mxu1 %v1236_v43  ;;  %2571 = vmatprep.mubr.msk.bf16.mxu1 %vm2849_vm1, %v2848_v8  ;;  %v879_v47 = vpack.c.bf16 %v878_v45, %v878_v45  ;;  %v2746_v43 = vld [vmem:[%s3416_s3 + $0x30] sm:$0xff]  }
 0x616   : > { %2583 = vmatprep.subr.bf16.mxu1 %v2848_v8 }
 0x61c   : > { %2572 = vmatmul.mubr.msk.bf16.vlgmr.msra.gmra.mrb[16].mxu1 %vm773_vm2, %v879_v47  ;;  %v2748_v47 = vld [vmem:[%s3394_s7 + $0x30] sm:$0xff]  }
 0x61d   : > { %2584 = vmatpush3.bf16.msra.mxu1 %v2740_v46  ;;  %2587 = vmatprep.mubr.msk.bf16.mxu1 %vm2849_vm1, %v2848_v8  ;;  %v2747_v46 = vld [vmem:[%s3416_s3 + $0x38] sm:$0xff]   ;;  %s3344_s3 = scalar_lea.hbm %s3404_s17, %s2416_s29 }
 0x61e   : > { %2585 = vmatprep.subr.bf16.mxu1 %v2848_v8 }
 0x621   : > { %2586 = vmatpush3.bf16.msra.mxu1 %v2741_v48  ;;  %v2749_v48 = vld [vmem:[%s3394_s7 + $0x38] sm:$0xff]  }
 0x622   : > { %2599 = vmatprep.subr.bf16.mxu1 %v2848_v8 }
 0x624   : > { %2588 = vmatmul.mubr.msk.bf16.vlgmr.msra.gmra.mrb[20].mxu1 %vm548_vm0, %v3023_v20 }
 0x625   : > { %2601 = vmatprep.mubr.msk.bf16.mxu1 %vm2849_vm1, %v2848_v8 }
 0x6a0   : > { %v1133_v51 = vpop.xlane.xlu1 %1132 }
 0x6a1   : > { %2770 = vrcp.f32 %v1133_v51 }
 0x6ab   : > { %v2771_v52 = vpop.eup %2770 }
 0x6e7   : > { %v1175_v53 = vpop.f32.mrb[12].mxu1 }
 0x6e8   : > { %v1182_v54 = vmul.f32 %v2771_v52, %v1175_v53  ;;  %v2561_v55 = vpop.f32.mrb[13].mxu1 }
 0x6e9   : > { %v1178_v56 = vpop.f32.mrb[14].mxu1 }
 0x6ea   : > { %v1183_v58 = vpack.c.bf16 %v1182_v54, %v1182_v54  ;;  %v2562_v59 = vpop.f32.mrb[15].mxu1 }
 0x6ec   : > { %2566 = vmatmul.mubr.msk.bf16.vlgmr.msra.gmra.mrb[24].mxu0 %vm773_vm2, %v1183_v58 }
 0x6ed   : > { %2576 = vmatpush3.bf16.msra.mxu0 %v2742_v57  ;;  %2579 = vmatprep.mubr.msk.bf16.mxu0 %vm2849_vm1, %v2848_v8  ;;  %v2750_v57 = vld [vmem:[%s3392_s5 + $0x30] sm:$0xff]  }
 0x6ee   : > { %2577 = vmatprep.subr.bf16.mxu0 %v2848_v8 }
 0x6ef   : > { %v1272_v61 = vpop.f32.mrb[16].mxu1 }
 0x6f0   : > { %v2573_v62 = vpop.f32.mrb[17].mxu1 }
 0x6f1   : > { %v1275_v63 = vpop.f32.mrb[18].mxu1  ;;  %2578 = vmatpush3.bf16.msra.mxu0 %v2743_v60  ;;  %v2751_v60 = vld [vmem:[%s3392_s5 + $0x38] sm:$0xff]  }
 0x6f2   : > { %v2574_v2 = vpop.f32.mrb[19].mxu1  ;;  %2591 = vmatprep.subr.bf16.mxu0 %v2848_v8 }
 0x6f3   : > { %v2391_v2 = vld [vmem:[%s3395_s8 + $0x3] ss:$0 sm:$0xff] }
 0x6f4   : > { %2580 = vmatmul.mubr.msk.bf16.vlgmr.msra.gmra.mrb[28].mxu0 %vm548_vm0, %v3023_v20 }
 0x6f5   : > { %2592 = vmatpush3.bf16.msra.mxu0 %v2744_v1  ;;  %2595 = vmatprep.mubr.msk.bf16.mxu0 %vm2849_vm1, %v2848_v8 }
 0x6f6   : > { %2593 = vmatprep.subr.bf16.mxu0 %v2848_v8 }
 0x6f7   : > { %v1402_v5 = vpop.f32.mrb[20].mxu1 }
 0x6f8   : > { %v1403_v6 = vadd.f32 %v2351_v3, %v1402_v5  ;;  %v2589_v7 = vpop.f32.mrb[21].mxu1 }
 0x6f9   : > { %v1405_v9 = vpop.f32.mrb[22].mxu1  ;;  %2594 = vmatpush3.bf16.msra.mxu0 %v2745_v4 }
 0x6fa   : > { %v1474_v10 = vpack.c.bf16 %v1403_v6, %v1403_v6  ;;  %v2590_v11 = vpop.f32.mrb[23].mxu1  ;;  %2605 = vmatprep.subr.bf16.mxu0 %v2848_v8 }
 0x6fc   : > { %v1480_v12 = vsel %vm773_vm2, %v1474_v10, 0  ;;  %2596 = vmatmul.mubr.msk.bf16.vlgmr.msra.gmra.mrb[32].mxu0 %vm548_vm0, %v3023_v20 }
 0x6fd   : > { %2600 = vmatpush3.bf16.xpose.msra.mxu1 %v1480_v12  ;;  %2607 = vmatprep.mubr.msk.bf16.mxu0 %vm2849_vm1, %v2848_v8 }
 0x6fe   : > { %2611 = vmatprep.subr.bf16.mxu1 %v2848_v8 }
 0x7bf   : > { %v1226_v13 = vpop.f32.mrb[24].mxu0 }
 0x7c0   : > { %v3185_v14 = vadd.f32 %v1272_v61, %v1226_v13  ;;  %v2567_v15 = vpop.f32.mrb[25].mxu0 }
 0x7c1   : > { %v1229_v16 = vpop.f32.mrb[26].mxu0 }
 0x7c2   : > { %v2568_v17 = vpop.f32.mrb[27].mxu0  ;;  %v2382_v16 = vld [vmem:[%s3393_s6 + $0x3] ss:$0 sm:$0xff] }
 0x7c7   : > { %v1337_v19 = vpop.f32.mrb[28].mxu0 }
 0x7c8   : > { %v1338_v21 = vadd.f32 %v2342_v18, %v1337_v19  ;;  %v2581_v22 = vpop.f32.mrb[29].mxu0 }
 0x7c9   : > { %v1340_v23 = vpop.f32.mrb[30].mxu0 }
 0x7ca   : > { %v1473_v24 = vpack.c.bf16 %v1338_v21, %v1338_v21  ;;  %v2582_v25 = vpop.f32.mrb[31].mxu0 }
 0x7cc   : > { %2602 = vmatmul.mubr.msk.bf16.vlgmr.msra.gmra.mrb[24].mxu1 %vm773_vm2, %v1473_v24  ;;  %v2373_v24 = vld [vmem:[%s3419_s4 + $0x3] ss:$0 sm:$0xff]  ;;  %s2790_s4 = scalar_lea.vmem %s2789_s19, 256 }
 0x7cd   : > { %2613 = vmatprep.mubr.msk.bf16.mxu1 %vm2849_vm1, %v2848_v8  ;;  %2612 = vmatpush3.bf16.msra.mxu1 %v1587_v50  ;;  %p2792_p1 = scmp.lt.s32.totalorder %s2790_s4, %s2784_s22 }
 0x7ce   : > { %2625 = vmatprep.subr.bf16.mxu1 %v2848_v8 }
 0x7cf   : > { %v1467_v27 = vpop.f32.mrb[32].mxu0  ;;  %p2793_p2 = por %p2792_p1, %p2791_p0 }
 0x7d0   : > { %v1468_v28 = vadd.f32 %v2360_v26, %v1467_v27  ;;  %v2597_v29 = vpop.f32.mrb[33].mxu0 }
 0x7d1   : > { %v1470_v30 = vpop.f32.mrb[34].mxu0  ;;  %p2794_p3 = pnand %p2793_p2, %p2787_p13 }
 0x7d2   : > { %v1475_v31 = vpack.c.bf16 %v1468_v28, %v1468_v28  ;;  %v2598_v32 = vpop.f32.mrb[35].mxu0 }
 0x7d4   : > { %v1536_v33 = vsel %vm833_vm3, %v1475_v31, 0 }
 0x7d5   : > { %2606 = vmatpush3.bf16.msra.mxu0 %v1536_v33 }
 0x7d6   : > { %2617 = vmatprep.subr.bf16.mxu0 %v2848_v8 }
 0x89f   : > { %v1516_v34 = vpop.f32.mrb[24].mxu1 }
 0x8a0   : > { %v2603_v35 = vpop.f32.mrb[25].mxu1  ;;  %v1522_v36 = vsel %vm773_vm2, %v1516_v34, -inf }
 0x8a1   : > { %1523 = vmax.xlane.f32.xlu0 %v1522_v36  ;;  %v1519_v37 = vpop.f32.mrb[26].mxu1 }
 0x8a2   : > { %v2604_v38 = vpop.f32.mrb[27].mxu1 }
 0x8a3   : > { %v2397_v38 = vld [vmem:[%s3396_s9 + $0xc] sm:$0xf] }
 0x92e   : > { %v1524_v39 = vpop.xlane.xlu0 %1523 }
 0x92f   : > { %v1525_v40 = vsub.f32 %v1516_v34, %v1524_v39  ;;  %v1939_v39 = vsel %vm833_vm3, %v2397_v38, 0 }
 0x931   : > { %v1526_v41 = vmul.f32 1.442695, %v1525_v40 }
 0x933   : > { %2772 = vpow2.f32 %v1526_v41 }
 0x93d   : > { %v2773_v42 = vpop.eup %2772 }
 0x93e   : > { %v1528_v44 = vsel %vm773_vm2, %v2773_v42, 0.0  ;;  %v1531_v45 = vpack.c.bf16 %v2773_v42, %v2773_v42 }
 0x93f   : > { %1529 = vadd.xlane.f32.xlu1 %v1528_v44 }
 0x940   : > { %2608 = vmatmul.mubr.msk.bf16.vlgmr.msra.gmra.mrb[36].mxu0 %vm773_vm2, %v1531_v45 }
 0x941   : > { %2618 = vmatpush3.bf16.msra.mxu0 %v2746_v43  ;;  %2621 = vmatprep.mubr.msk.bf16.mxu0 %vm2849_vm1, %v2848_v8 }
 0x942   : > { %2619 = vmatprep.subr.bf16.mxu0 %v2848_v8 }
 0x945   : > { %2620 = vmatpush3.bf16.msra.mxu0 %v2747_v46 }
 0x946   : > { %2633 = vmatprep.subr.bf16.mxu0 %v2848_v8 }
 0x948   : > { %2622 = vmatmul.mubr.msk.bf16.vlgmr.msra.gmra.mrb[40].mxu0 %vm548_vm0, %v3023_v20 }
 0x949   : > { %2634 = vmatpush3.bf16.msra.mxu0 %v2748_v47  ;;  %2637 = vmatprep.mubr.msk.bf16.mxu0 %vm2849_vm1, %v2848_v8 }
 0x94a   : > { %2635 = vmatprep.subr.bf16.mxu0 %v2848_v8 }
 0x94d   : > { %2636 = vmatpush3.bf16.msra.mxu0 %v2749_v48 }
 0x94e   : > { %2647 = vmatprep.subr.bf16.mxu0 %v2848_v8 }
 0x950   : > { %2638 = vmatmul.mubr.msk.bf16.vlgmr.msra.gmra.mrb[44].mxu0 %vm548_vm0, %v3023_v20 }
 0x951   : > { %2649 = vmatprep.mubr.msk.bf16.mxu0 %vm2849_vm1, %v2848_v8 }
 0x9cc   : > { %v1530_v51 = vpop.xlane.xlu1 %1529 }
 0x9cd   : > { %2774 = vrcp.f32 %v1530_v51  ;;  %v2399_v51 = vld [vmem:[%s3397_s10] ss:$0 sm:$0xff] }
 0x9d7   : > { %v2775_v52 = vpop.eup %2774 }
 0xa13   : > { %v1572_v53 = vpop.f32.mrb[36].mxu0 }
 0xa14   : > { %v1579_v54 = vmul.f32 %v2775_v52, %v1572_v53  ;;  %v2609_v55 = vpop.f32.mrb[37].mxu0 }
 0xa15   : > { %v1575_v56 = vpop.f32.mrb[38].mxu0 }
 0xa16   : > { %v1580_v58 = vpack.c.bf16 %v1579_v54, %v1579_v54  ;;  %v2610_v59 = vpop.f32.mrb[39].mxu0 }
 0xa18   : > { %2614 = vmatmul.mubr.msk.bf16.vlgmr.msra.gmra.mrb[28].mxu1 %vm773_vm2, %v1580_v58 }
 0xa19   : > { %2626 = vmatpush3.bf16.msra.mxu1 %v2750_v57  ;;  %2629 = vmatprep.mubr.msk.bf16.mxu1 %vm2849_vm1, %v2848_v8 }
 0xa1a   : > { %2627 = vmatprep.subr.bf16.mxu1 %v2848_v8 }
 0xa1b   : > { %v1689_v61 = vpop.f32.mrb[40].mxu0 }
 0xa1c   : > { %v2623_v62 = vpop.f32.mrb[41].mxu0 }
 0xa1d   : > { %v1692_v63 = vpop.f32.mrb[42].mxu0  ;;  %2628 = vmatpush3.bf16.msra.mxu1 %v2751_v60  ;;  %v2752_v62 = vld [vmem:[%s3400_s13] sm:$0xff]  }
 0xa1e   : > { %v2624_v1 = vpop.f32.mrb[43].mxu0  ;;  %2641 = vmatprep.subr.bf16.mxu1 %v2848_v8  ;;  %v2754_v63 = vld [vmem:[%s3402_s15] sm:$0xff]  }
 0xa20   : > { %2630 = vmatmul.mubr.msk.bf16.vlgmr.msra.gmra.mrb[32].mxu1 %vm548_vm0, %v3023_v20 }
 0xa21   : > { %2643 = vmatprep.mubr.msk.bf16.mxu1 %vm2849_vm1, %v2848_v8 }
 0xa23   : > { %v1819_v3 = vpop.f32.mrb[44].mxu0 }
 0xa24   : > { %v1820_v4 = vadd.f32 %v2391_v2, %v1819_v3  ;;  %v2639_v5 = vpop.f32.mrb[45].mxu0 }
 0xa25   : > { %v1822_v6 = vpop.f32.mrb[46].mxu0  ;;  %v2400_v5 = vld [vmem:[%s3398_s11] ss:$0 sm:$0xff] }
 0xa26   : > { %v1827_v7 = vpack.c.bf16 %v1820_v4, %v1820_v4  ;;  %v2640_v9 = vpop.f32.mrb[47].mxu0 }
 0xa28   : > { %v1888_v10 = vsel %vm833_vm3, %v1827_v7, 0  ;;  %v2401_v7 = vld [vmem:[%s3399_s12] ss:$0 sm:$0xff] }
 0xa29   : > { %2648 = vmatpush3.bf16.msra.mxu0 %v1888_v10 }
 0xa2a   : > { %2659 = vmatprep.subr.bf16.mxu0 %v2848_v8 }
 0xaeb   : > { %v1623_v11 = vpop.f32.mrb[28].mxu1 }
 0xaec   : > { %v1629_v20 = vadd.f32 %v1623_v11, %v3185_v14  ;;  %v2615_v12 = vpop.f32.mrb[29].mxu1  ;;  %v1690_v14 = vadd.f32 %v2373_v24, %v1689_v61 }
 0xaed   : > { %v1626_v13 = vpop.f32.mrb[30].mxu1  ;;  %v2756_v12 = vld [vmem:[%s3402_s15 + $0x10] sm:$0xff]  }
 0xaee   : > { %v2616_v15 = vpop.f32.mrb[31].mxu1  ;;  %v1825_v26 = vpack.c.bf16 %v1690_v14, %v1690_v14  ;;  %v2757_v13 = vld [vmem:[%s3402_s15 + $0x18] sm:$0xff]  }
 0xaef   : > { %v2758_v15 = vld [vmem:[%s3402_s15 + $0x20] sm:$0xff]  }
 0xaf3   : > { %v1754_v17 = vpop.f32.mrb[32].mxu1 }
 0xaf4   : > { %v1755_v18 = vadd.f32 %v2382_v16, %v1754_v17  ;;  %v2631_v19 = vpop.f32.mrb[33].mxu1  ;;  %v2759_v16 = vld [vmem:[%s3402_s15 + $0x28] sm:$0xff]   ;;  %v2760_v17 = vld [vmem:[%s3402_s15 + $0x30] sm:$0xff]  }
 0xaf5   : > { %v1757_v21 = vpop.f32.mrb[34].mxu1  ;;  %v2402_v19 = vld [vmem:[%s3401_s14] ss:$0 sm:$0xff] }
 0xaf6   : > { %v1826_v22 = vpack.c.bf16 %v1755_v18, %v1755_v18  ;;  %v2632_v23 = vpop.f32.mrb[35].mxu1  ;;  %v2761_v18 = vld [vmem:[%s3402_s15 + $0x38] sm:$0xff]  }
 0xaf8   : > { %v1832_v25 = vsel %vm773_vm2, %v1826_v22, 0 }
 0xaf9   : > { %2642 = vmatpush3.bf16.xpose.msra.mxu1 %v1832_v25 }
 0xafa   : > { %2653 = vmatprep.subr.bf16.mxu1 %v2848_v8 }
 0xb00   : > { %2644 = vmatmul.mubr.msk.bf16.vlgmr.msra.gmra.mrb[36].mxu1 %vm773_vm2, %v1825_v26 }
 0xb01   : > { %2655 = vmatprep.mubr.msk.bf16.mxu1 %vm2849_vm1, %v2848_v8  ;;  %2654 = vmatpush3.bf16.msra.mxu1 %v1939_v39 }
 0xb02   : > { %2667 = vmatprep.subr.bf16.mxu1 %v2848_v8 }
 0xbd3   : > { %v1868_v27 = vpop.f32.mrb[36].mxu1 }
 0xbd4   : > { %v2645_v28 = vpop.f32.mrb[37].mxu1  ;;  %v1874_v29 = vsel %vm773_vm2, %v1868_v27, -inf }
 0xbd5   : > { %1875 = vmax.xlane.f32.xlu0 %v1874_v29  ;;  %v1871_v30 = vpop.f32.mrb[38].mxu1 }
 0xbd6   : > { %v2646_v31 = vpop.f32.mrb[39].mxu1 }
 0xc62   : > { %v1876_v32 = vpop.xlane.xlu0 %1875 }
 0xc63   : > { %v1877_v33 = vsub.f32 %v1868_v27, %v1876_v32 }
 0xc65   : > { %v1878_v34 = vmul.f32 1.442695, %v1877_v33 }
 0xc67   : > { %2776 = vpow2.f32 %v1878_v34  ;;  %v2406_v34 = vld [vmem:[%s3403_s16] ss:$0 sm:$0xff] }
 0xc71   : > { %v2777_v35 = vpop.eup %2776 }
 0xc72   : > { %v1880_v36 = vsel %vm773_vm2, %v2777_v35, 0.0  ;;  %v1883_v37 = vpack.c.bf16 %v2777_v35, %v2777_v35 }
 0xc73   : > { %1881 = vadd.xlane.f32.xlu1 %v1880_v36 }
 0xc74   : > { %2650 = vmatmul.mubr.msk.bf16.vlgmr.msra.gmra.mrb[48].mxu0 %vm773_vm2, %v1883_v37 }
 0xc75   : > { %2663 = vmatprep.mubr.msk.bf16.mxu0 %vm2849_vm1, %v2848_v8  ;;  %2660 = vmatpush3.bf16.msra.mxu0 %v2752_v62 }
 0xc76   : > { %2661 = vmatprep.subr.bf16.mxu0 %v2848_v8 }
 0xd00   : > { %v1882_v40 = vpop.xlane.xlu1 %1881 }
 0xd01   : > { %2778 = vrcp.f32 %v1882_v40 }
 0xd0b   : > { %v2779_v41 = vpop.eup %2778 }
 0xd47   : > { %v1924_v42 = vpop.f32.mrb[48].mxu0 }
 0xd48   : > { %v1931_v43 = vmul.f32 %v2779_v41, %v1924_v42  ;;  %v2651_v44 = vpop.f32.mrb[49].mxu0 }
 0xd49   : > { %v1927_v45 = vpop.f32.mrb[50].mxu0 }
 0xd4a   : > { %v1932_v46 = vpack.c.bf16 %v1931_v43, %v1931_v43  ;;  %v2652_v47 = vpop.f32.mrb[51].mxu0 }
 0xd4c   : > { %2656 = vmatmul.mubr.msk.bf16.vlgmr.msra.gmra.mrb[40].mxu1 %vm773_vm2, %v1932_v46 }
 0xd4d   : > { %2683 = vmatprep.mubr.msk.bf16.mxu1 %vm2849_vm1, %v2848_v8  ;;  %2668 = vmatpush3.bf16.msra.mxu1 %v2754_v63 }
 0xd4e   : > { %2669 = vmatprep.subr.bf16.mxu1 %v2848_v8 }
 0xe1f   : > { %v1975_v48 = vpop.f32.mrb[40].mxu1 }
 0xe20   : > { %v1981_v49 = vadd.f32 %v1975_v48, %v1629_v20  ;;  %v2657_v50 = vpop.f32.mrb[41].mxu1  ;;  %v2755_v20 = vld [vmem:[%s3402_s15 + $0x8] sm:$0xff]  }
 0xe21   : > { %v1978_v52 = vpop.f32.mrb[42].mxu1  ;;  %2670 = vmatpush3.bf16.msra.mxu1 %v2755_v20 }
 0xe22   : > { %v1982_v53 = vadd.f32 %v1981_v49, %v2994_v0  ;;  %v2658_v54 = vpop.f32.mrb[43].mxu1  ;;  %v2753_v0 = vld [vmem:[%s3400_s13 + $0x8] sm:$0xff]   ;;  %2671 = vmatprep.subr.bf16.mxu1 %v2848_v8 }
 0xe23   : > { %2662 = vmatpush3.bf16.msra.mxu0 %v2753_v0 }
 0xe24   : > { %v3281_v55 = vadd.f32 %v2399_v51, %v1982_v53 }
 0xe25   : > { %2672 = vmatpush3.bf16.msra.mxu1 %v2756_v12 }
 0xe26   : > { %v1993_v56 = vsel %vm548_vm0, %v3281_v55, 0.0  ;;  %2673 = vmatprep.subr.bf16.mxu1 %v2848_v8 }
 0xe27   : > { %1994 = vadd.xlane.f32.xlu0 %v1993_v56 }
 0xe29   : > { %2674 = vmatpush3.bf16.msra.mxu1 %v2757_v13 }
 0xe2a   : > { %2675 = vmatprep.subr.bf16.mxu1 %v2848_v8 }
 0xe2d   : > { %2676 = vmatpush3.bf16.msra.mxu1 %v2758_v15 }
 0xe2e   : > { %2677 = vmatprep.subr.bf16.mxu1 %v2848_v8 }
 0xe31   : > { %2678 = vmatpush3.bf16.msra.mxu1 %v2759_v16 }
 0xe32   : > { %2679 = vmatprep.subr.bf16.mxu1 %v2848_v8 }
 0xe35   : > { %2680 = vmatpush3.bf16.msra.mxu1 %v2760_v17 }
 0xe36   : > { %2681 = vmatprep.subr.bf16.mxu1 %v2848_v8 }
 0xe39   : > { %2682 = vmatpush3.bf16.msra.mxu1 %v2761_v18 }
 0xeb4   : > { %v1995_v57 = vpop.xlane.xlu0 %1994 }
 0xeb5   : > { %v1996_v58 = vmul.f32 0.03125, %v1995_v57 }
 0xeb7   : > { %v1997_v59 = vsub.f32 %v3281_v55, %v1996_v58 }
 0xeb9   : > { %v1998_v60 = vmul.f32 %v1997_v59, %v1997_v59 }
 0xebb   : > { %v1999_v61 = vsel %vm548_vm0, %v1998_v60, 0.0 }
 0xebc   : > { %2000 = vadd.xlane.f32.xlu1 %v1999_v61 }
 0xf49   : > { %v2001_v1 = vpop.xlane.xlu1 %2000 }
 0xf4a   : > { %v2002_v2 = vmul.f32 0.03125, %v2001_v1 }
 0xf4c   : > { %v2003_v3 = vadd.f32 1e-06, %v2002_v2 }
 0xf4e   : > { %2780 = vrsqrt.f32 %v2003_v3 }
 0xf58   : > { %v2781_v4 = vpop.eup %2780 }
 0xf59   : > { %v2005_v6 = vmul.f32 %v2781_v4, %v1997_v59 }
 0xf5b   : > { %v2012_v9 = vmul.f32 %v2400_v5, %v2005_v6 }
 0xf5d   : > { %v2019_v10 = vadd.f32 %v2401_v7, %v2012_v9 }
 0xf5f   : > { %v2020_v11 = vpack.c.bf16 %v2019_v10, %v2019_v10 }
 0xf61   : > { %2664 = vmatmul.mubr.msk.bf16.vlgmr.msra.gmra.mrb[52].mxu0 %vm548_vm0, %v2020_v11 }
0x1034   : > { %v2081_v21 = vpop.f32.mrb[52].mxu0 }
0x1035   : > { %v2082_v22 = vadd.f32 %v2402_v19, %v2081_v21  ;;  %v2665_v23 = vpop.f32.mrb[53].mxu0 }
0x1036   : > { %v2084_v24 = vpop.f32.mrb[54].mxu0 }
0x1037   : > { %v2088_v25 = vmul.f32 %v2082_v22, %v2082_v22  ;;  %v2666_v14 = vpop.f32.mrb[55].mxu0  ;;  %v2087_v8 = vmul.f32 0.5, %v2082_v22 }
0x1039   : > { %v2089_v26 = vmul.f32 %v2088_v25, %v2082_v22 }
0x103b   : > { %v2090_v27 = vmul.f32 0.044715, %v2089_v26 }
0x103d   : > { %v2091_v28 = vadd.f32 %v2090_v27, %v2082_v22 }
0x103f   : > { %v2092_v29 = vmul.f32 0.7978846, %v2091_v28 }
0x1041   : > { %2782 = vtanh.f32 %v2092_v29 }
0x104b   : > { %v2783_v30 = vpop.eup %2782 }
0x104c   : > { %v2094_v31 = vadd.f32 1.0, %v2783_v30 }
0x104e   : > { %v2095_v32 = vmul.f32 %v2094_v31, %v2087_v8 }
0x1050   : > { %v2096_v33 = vpack.c.bf16 %v2095_v32, %v2095_v32 }
0x1052   : > { %2684 = vmatmul.mubr.bf16.vlgmr.msra.gmra.mrb[44].mxu1 %v2096_v33 }
0x1125   : > { %v2202_v35 = vpop.f32.mrb[44].mxu1 }
0x1126   : > { %v2203_v36 = vadd.f32 %v2406_v34, %v2202_v35  ;;  %v2685_v37 = vpop.f32.mrb[45].mxu1 }
0x1127   : > { %v2205_v38 = vpop.f32.mrb[46].mxu1 }
0x1128   : > { %v2208_v39 = vadd.f32 %v2203_v36, %v3281_v55  ;;  %v2686_v40 = vpop.f32.mrb[47].mxu1 }
0x112a   : > { %2209 = vst.msk [vmem:[%s539_s30] sm:$0xff] %vm548_vm0, %v2208_v39 }
0x112b   : > { %2797 = shalt.err (!%p2794_p3)
}
0x112c   : > { %s2798_s2 = scalar_lea.hbm %s3344_s3, 128  ;;  %s2802_s30 = scalar_lea.hbm %s3404_s17, 256 }
0x112d   : > { %p2799_p4 = scmp.ne.s32.totalorder %s3344_s3, %s2798_s2  ;;  %p2803_p9 = scmp.lt.u32.totalorder %s3344_s3, %s3404_s17 }
0x112e   : > { %p2804_p10 = scmp.lt.u32.totalorder %s2802_s30, %s2798_s2  ;;  %p2806_p12 = scmp.lt.u32.totalorder %s2798_s2, %s3344_s3 }
0x112f   : > { %p2800_p7 = pnand %p2799_p4, %p2979_p5 }
0x1130   : > { %p2805_p11 = por %p2804_p10, %p2803_p9 }
0x1131   : > { %p2801_p8 = pneg %p2800_p7 }
0x1132   : > { %p2807_p13 = por %p2806_p12, %p2805_p11 }
0x1134   : > { %p2808_p0 = pnand %p2807_p13, %p2801_p8 }
0x1136   : > { %2811 = shalt.err (!%p2808_p0)
}
0x1137   : > { %2687 = dma.vmem_to_hbm [thread:$0]  (%p2979_p5), %s3346_s18, 128, %s3344_s3, %s2211_s28  }
0x1138 PF: > { %p2693_p1 = scmp.ge.s32.totalorder %s2846_s27, 2  ;;  %s2236_s4 = sand.u32 1, %s2834_s24  }
0x1139   : > { %s2237_s22 = scalar_lea.sflag [#allocation3], %s2236_s4 }
0x113a   : > { %p2690_p2 = pnand %p2693_p1, %p2983_p6 }
0x113c   : > { %2829 = dma.done.wait (!%p2690_p2), %s2237_s22, 128  }
0x113d   : > { %2831 = vsyncadd (!%p2690_p2), %s2237_s22, 4294967168  ;;  %s3420_s19 = sld [smem:[#allocation5_spill]]  ;;  %s3421_s26 = sld [smem:[#allocation6_spill]] }
0x113e   : > { %p27_p3 = scmp.ge.s32.totalorder %s2966_s0, 4   ;;  %s3422_s24 = smov %s2838_s25 }
0x113f   : > { %s3424_s27 = smov %s2966_s0 }
0x1140   :  { %29 = sbr.rel (!%p27_p3) target bundleno = 9 (0x9), region = 144 }
0x1143   : > { %s3423_s25 = smov %s3420_s19 }
0x1147   :  { %2242 = vsyncpa [#allocation3], 1 }
0x1148   :  { %2244 = vsyncpa [#allocation3 + $0x1], 1 }

</bundles_post_ra>
